<compile_context>
chip_gen: v5e
topology: v5e:2x2
jax: 0.10.0
libtpu: 0.0.40
codegen_flags: <defaults>
</compile_context>

<pallas_src>
import jax
import jax.numpy as jnp
from jax.experimental import pallas as pl
from jax.experimental.pallas import tpu as pltpu


# ----------------------------- configuration ------------------------------
TEXT_DIM = 32
AUDIO_DIM = 32
VIDEO_DIM = 64
IN_SIZE = TEXT_DIM + AUDIO_DIM + VIDEO_DIM   # 128
HIDDEN_DIM = 32
OUTPUT_DIM1 = 6
OUTPUT_DIM2 = 1
NUM_LAYERS = 2          # the fused kernel implements exactly 2 stacked layers
BATCH = 2
SEQ_LEN = 8
LANE = 128              # lane-dense packed output width (== 4 * HIDDEN_DIM)


# ------------------------------- kernel ------------------------------------
def make_ef_lstm_kernel(seq_len, batch, hidden_dim, in_size):
    T, B, H, D = seq_len, batch, hidden_dim, in_size
    G = 4 * H
    # Row offsets inside the single packed weight/bias slab (all 8-aligned).
    R_WIH0 = 0                 # (D, 4H)   layer-0 input weights (ifo *0.5)
    R_WHH0 = R_WIH0 + D        # (H, 4H)   layer-0 recurrent weights
    R_WIH1 = R_WHH0 + H        # (H, 4H)   layer-1 input weights
    R_WHH1 = R_WIH1 + H        # (H, 4H)   layer-1 recurrent weights
    R_WL = R_WHH1 + H          # (H, 128)  [wl | 0]
    R_WOUT = R_WL + H          # (H, 128)  [I | W_emo | W_val | 0]
    R_BIAS = R_WOUT + H        # (4, 128)  rows: b0_s, b1_s, [bl|0], b_out

    def kernel(x_ref, w_ref, out_ref, gi0_ref):
        f32 = jnp.float32

        wih0 = w_ref[R_WIH0:R_WIH0 + D, :]
        whh0 = w_ref[R_WHH0:R_WHH0 + H, :]
        wih1 = w_ref[R_WIH1:R_WIH1 + H, :]
        whh1 = w_ref[R_WHH1:R_WHH1 + H, :]
        bias4 = w_ref[R_BIAS:R_BIAS + 4, :]            # aligned (4,128) load
        b0 = bias4[0:1, :]
        b1b = jnp.broadcast_to(bias4[1:2, :], (B, G))  # bcast hoisted off loop

        # Hoisted layer-0 input projection for ALL timesteps (time-major rows
        # t*B + b) -> one GEMM; the per-phase fetch below is a free static
        # 2-sublane slice of this VMEM buffer, not a gather.
        gi0_ref[...] = (jnp.dot(x_ref[...], wih0, preferred_element_type=f32)
                        + jnp.broadcast_to(b0, (T * B, G)))

        def cell(gates, c):
            # i/f/o gate columns were pre-scaled by 0.5 in weights/biases, so
            # sigmoid(x) = 0.5*tanh(x/2) + 0.5 -> one full-width tanh for the
            # gates plus tanh(c_new): 2 EUP pushes per cell instead of 3.
            th = jnp.tanh(gates)
            sg = th * 0.5 + 0.5
            i_g = sg[:, 0 * H:1 * H]
            f_g = sg[:, 1 * H:2 * H]
            g_g = th[:, 2 * H:3 * H]
            o_g = sg[:, 3 * H:4 * H]
            c_new = f_g * c + i_g * g_g
            h_new = o_g * jnp.tanh(c_new)
            return h_new, c_new

        zeros = jnp.zeros((B, H), f32)
        h0, c0 = zeros, zeros
        h1, c1 = zeros, zeros

        # Wavefront over the two layers: phase p runs layer-0 step p and
        # layer-1 step p-1 (its inputs h0[p-1], h1[p-2] are already ready).
        # The two cells inside a phase are data-independent, so their MXU /
        # EUP / VPU work overlaps; the serial chain is T+1 phases.
        # Fully unrolled (T is small & static) so the scheduler sees it all.
        for p in range(T + 1):
            h0_new, c0_new = h0, c0
            if p < T:
                g0 = gi0_ref[p * B:(p + 1) * B, :]
                if p > 0:                      # h0 == 0 at p == 0: skip matmul
                    g0 = g0 + jnp.dot(h0, whh0, preferred_element_type=f32)
                h0_new, c0_new = cell(g0, c0)
            if p >= 1:
                g1 = jnp.dot(h0, wih1, preferred_element_type=f32) + b1b
                if p > 1:                      # h1 == 0 at p == 1: skip matmul
                    g1 = g1 + jnp.dot(h1, whh1, preferred_element_type=f32)
                h1, c1 = cell(g1, c1)
            h0, c0 = h0_new, c0_new
            # TODO(synk): PyTorch applies inter-layer dropout in training mode;
            # eval-mode (identity) semantics are implemented here.

        # Fused head epilogue: feat = relu(h1 @ wl + bl); the packed output
        # slab [feat | emos | vals | 0] is one lane-dense matmul
        # feat @ [I | W_emo | W_val | 0] + [0 | b_emo | b_val | 0].
        wl = w_ref[R_WL:R_WL + H, :][:, :H]
        bl = bias4[2:3, :H]
        wout = w_ref[R_WOUT:R_WOUT + H, :]
        bout = bias4[3:4, :]
        feat = jnp.maximum(
            jnp.dot(h1, wl, preferred_element_type=f32) + bl, 0.0)
        out_ref[...] = jnp.dot(feat, wout, preferred_element_type=f32) + bout

    return kernel


# ------------------------------ wrapper -------------------------------------
def ef_lstm_pallas(texts, audios, videos, lstm_params, head_params):
    B, T, Dt = texts.shape
    Da, Dv = audios.shape[-1], videos.shape[-1]
    D = Dt + Da + Dv
    H = HIDDEN_DIM
    f32 = jnp.float32
    assert 4 * H == LANE, "packed slab assumes gate width == lane width"
    assert H + OUTPUT_DIM1 + OUTPUT_DIM2 <= LANE

    (wih0, whh0, b0), (wih1, whh1, b1) = lstm_params
    wl, bl, w1, bo1, w2, bo2 = head_params

    # Time-major fused input (row = t*B + b); tiny one-time reorder so the
    # per-phase gate fetch inside the kernel is a static contiguous slice.
    x = jnp.concatenate([texts, audios, videos], axis=-1)            # (B,T,D)
    x_tm = jnp.transpose(x, (1, 0, 2)).reshape(T * B, D)

    def scale_ifo(m):
        # Halve the i/f/o gate columns (g untouched) -> sigmoid via one tanh.
        return jnp.concatenate(
            [m[:, :2 * H] * 0.5, m[:, 2 * H:3 * H], m[:, 3 * H:] * 0.5],
            axis=-1)

    wih0_s, whh0_s, b0_s = scale_ifo(wih0), scale_ifo(whh0), scale_ifo(b0)
    wih1_s, whh1_s, b1_s = scale_ifo(wih1), scale_ifo(whh1), scale_ifo(b1)

    # Head weights packed lane-dense (one-time, tiny).
    wl_pad = jnp.concatenate([wl, jnp.zeros((H, LANE - H), f32)], axis=1)
    bl_pad = jnp.concatenate([bl, jnp.zeros((1, LANE - H), f32)], axis=1)
    out_pad = LANE - H - OUTPUT_DIM1 - OUTPUT_DIM2
    w_out = jnp.concatenate(
        [jnp.eye(H, dtype=f32), w1, w2, jnp.zeros((H, out_pad), f32)], axis=1)
    b_out = jnp.concatenate(
        [jnp.zeros((1, H), f32), bo1, bo2, jnp.zeros((1, out_pad), f32)],
        axis=1)

    # ONE packed (292, 128) weight/bias slab -> a single input DMA instead of
    # many tiny ones; the kernel slices it statically (free .at[] views).
    w_slab = jnp.concatenate(
        [wih0_s, whh0_s, wih1_s, whh1_s, wl_pad, w_out,
         b0_s, b1_s, bl_pad, b_out], axis=0)

    vmem = pl.BlockSpec(memory_space=pltpu.MemorySpace.VMEM)
    slab = pl.pallas_call(
        make_ef_lstm_kernel(T, B, H, D),
        out_shape=jax.ShapeDtypeStruct((B, LANE), jnp.float32),
        in_specs=[vmem, vmem],
        out_specs=vmem,
        scratch_shapes=[pltpu.VMEM((T * B, 4 * H), jnp.float32)],
    )(x_tm, w_slab)

    features = slab[:, :H]
    emos_out = slab[:, H:H + OUTPUT_DIM1]
    vals_out = slab[:, H + OUTPUT_DIM1:H + OUTPUT_DIM1 + OUTPUT_DIM2]
    return features, emos_out, vals_out


@jax.jit
def ef_lstm_forward(texts, audios, videos, lstm_params, head_params):
    features, emos_out, vals_out = ef_lstm_pallas(
        texts, audios, videos, lstm_params, head_params)
    # dropout == identity (eval mode); .squeeze() is a no-op for B > 1.
    interloss = jnp.array(0, dtype=jnp.int32)
    return features, emos_out, vals_out, interloss


# ------------------------- deterministic parameters -------------------------
def init_params(key):
    H = HIDDEN_DIM
    bound = 1.0 / jnp.sqrt(jnp.float32(H))
    keys = jax.random.split(key, 4 * NUM_LAYERS + 6)
    ki = iter(range(len(keys)))

    def u(k, shape):
        return jax.random.uniform(keys[k], shape, jnp.float32, -bound, bound)

    lstm_params = []
    for l in range(NUM_LAYERS):
        d_in = IN_SIZE if l == 0 else H
        wih = u(next(ki), (d_in, 4 * H))       # (in, 4H)  == torch W_ih.T
        whh = u(next(ki), (H, 4 * H))          # (H, 4H)   == torch W_hh.T
        b_ih = u(next(ki), (1, 4 * H))
        b_hh = u(next(ki), (1, 4 * H))
        lstm_params.append((wih, whh, b_ih + b_hh))

    wl = u(next(ki), (H, H))
    bl = u(next(ki), (1, H))
    w1 = u(next(ki), (H, OUTPUT_DIM1))
    b1 = u(next(ki), (1, OUTPUT_DIM1))
    w2 = u(next(ki), (H, OUTPUT_DIM2))
    b2 = u(next(ki), (1, OUTPUT_DIM2))
    head_params = (wl, bl, w1, b1, w2, b2)
    return lstm_params, head_params


# ------------------------------ pure-JAX ref --------------------------------
def ref_forward(texts, audios, videos, lstm_params, head_params):
    hp = jax.lax.Precision.HIGHEST
    dot = lambda a, b: jnp.dot(a, b, precision=hp)
    x = jnp.concatenate([texts, audios, videos], axis=-1)  # (B, T, D)
    B, T, _ = x.shape
    H = HIDDEN_DIM
    inp = x
    h = None
    for l in range(NUM_LAYERS):
        wih, whh, b = lstm_params[l]
        h = jnp.zeros((B, H), jnp.float32)
        c = jnp.zeros((B, H), jnp.float32)
        outs = []
        for t in range(T):
            gates = dot(inp[:, t], wih) + dot(h, whh) + b
            i_g = jax.nn.sigmoid(gates[:, 0 * H:1 * H])
            f_g = jax.nn.sigmoid(gates[:, 1 * H:2 * H])
            g_g = jnp.tanh(gates[:, 2 * H:3 * H])
            o_g = jax.nn.sigmoid(gates[:, 3 * H:4 * H])
            c = f_g * c + i_g * g_g
            h = o_g * jnp.tanh(c)
            outs.append(h)
        inp = jnp.stack(outs, axis=1)
    wl, bl, w1, b1, w2, b2 = head_params
    feat = jnp.maximum(dot(h, wl) + bl, 0.0)
    return feat, dot(feat, w1) + b1, dot(feat, w2) + b2


# --------------------------------- main -------------------------------------
if __name__ == "__main__":
    key = jax.random.PRNGKey(0)
    k_t, k_a, k_v, k_p = jax.random.split(key, 4)

    texts = jax.random.normal(k_t, (BATCH, SEQ_LEN, TEXT_DIM), jnp.float32)
    audios = jax.random.normal(k_a, (BATCH, SEQ_LEN, AUDIO_DIM), jnp.float32)
    videos = jax.random.normal(k_v, (BATCH, SEQ_LEN, VIDEO_DIM), jnp.float32)

    lstm_params, head_params = init_params(k_p)

    features, emos_out, vals_out, interloss = ef_lstm_forward(
        texts, audios, videos, lstm_params, head_params)
    jax.block_until_ready((features, emos_out, vals_out, interloss))

    # Sanity check vs. pure-JAX reference.  The kernel restructures the math
    # (hoisted layer-0 projection, halved-weight tanh sigmoid, identity-packed
    # head matmul), so results are close but not bit-identical; expected diff
    # ~1e-6, use 1e-3 tolerance.
    f_ref, e_ref, v_ref = ref_forward(texts, audios, videos,
                                      lstm_params, head_params)
    assert jnp.allclose(features, f_ref, atol=1e-3, rtol=1e-3)
    assert jnp.allclose(emos_out, e_ref, atol=1e-3, rtol=1e-3)
    assert jnp.allclose(vals_out, v_ref, atol=1e-3, rtol=1e-3)
    assert int(interloss) == 0

    print("KERNEL_OK")
</pallas_src>

<mosaic_0001>
module attributes {stable_mosaic.version = 11 : i64} {
  func.func @kernel(%arg0: memref<16x128xf32, #tpu.memory_space<vmem>>, %arg1: memref<292x128xf32, #tpu.memory_space<vmem>>, %arg2: memref<2x128xf32, #tpu.memory_space<vmem>>, %arg3: memref<16x128xf32, #tpu.memory_space<vmem>>) attributes {dimension_semantics = [], scalar_prefetch = 0 : i64, scratch_operands = 1 : i64, tpu.core_type = #tpu.core_type<tc>} {
    %c0 = arith.constant 0 : index
    %c0_0 = arith.constant 0 : index
    %0 = vector.load %arg1[%c0, %c0_0] : memref<292x128xf32, #tpu.memory_space<vmem>>, vector<128x128xf32>
    %c128 = arith.constant 128 : index
    %c0_1 = arith.constant 0 : index
    %1 = vector.load %arg1[%c128, %c0_1] : memref<292x128xf32, #tpu.memory_space<vmem>>, vector<32x128xf32>
    %c160 = arith.constant 160 : index
    %c0_2 = arith.constant 0 : index
    %2 = vector.load %arg1[%c160, %c0_2] : memref<292x128xf32, #tpu.memory_space<vmem>>, vector<32x128xf32>
    %c192 = arith.constant 192 : index
    %c0_3 = arith.constant 0 : index
    %3 = vector.load %arg1[%c192, %c0_3] : memref<292x128xf32, #tpu.memory_space<vmem>>, vector<32x128xf32>
    %c288 = arith.constant 288 : index
    %c0_4 = arith.constant 0 : index
    %4 = vector.load %arg1[%c288, %c0_4] : memref<292x128xf32, #tpu.memory_space<vmem>>, vector<4x128xf32>
    %5 = vector.extract_strided_slice %4 {offsets = [0, 0], sizes = [1, 128], strides = [1, 1]} : vector<4x128xf32> to vector<1x128xf32>
    %6 = vector.extract_strided_slice %4 {offsets = [1, 0], sizes = [1, 128], strides = [1, 1]} : vector<4x128xf32> to vector<1x128xf32>
    %7 = vector.shape_cast %6 : vector<1x128xf32> to vector<1x128xf32>
    %8 = vector.broadcast %7 : vector<1x128xf32> to vector<2x128xf32>
    %c0_5 = arith.constant 0 : index
    %c0_6 = arith.constant 0 : index
    %9 = vector.load %arg0[%c0_5, %c0_6] : memref<16x128xf32, #tpu.memory_space<vmem>>, vector<16x128xf32>
    %cst = arith.constant dense<0.000000e+00> : vector<16x128xf32>
    %10 = tpu.matmul %9, %0, %cst {dimension_numbers = #tpu.dot_dimension_numbers<[1], [0], [0], [1], [0, 0, 1, 1], [], []>} : vector<16x128xf32>, vector<128x128xf32>, vector<16x128xf32> -> vector<16x128xf32>
    %11 = vector.shape_cast %5 : vector<1x128xf32> to vector<1x128xf32>
    %12 = vector.broadcast %11 : vector<1x128xf32> to vector<16x128xf32>
    %13 = arith.addf %10, %12 : vector<16x128xf32>
    %c0_7 = arith.constant 0 : index
    %c0_8 = arith.constant 0 : index
    %14 = vector.load %arg3[%c0_7, %c0_8] : memref<16x128xf32, #tpu.memory_space<vmem>>, vector<16x128xf32>
    tpu.vector_store %arg3[%c0_7, %c0_8], %13 {strides = array<i32>} : memref<16x128xf32, #tpu.memory_space<vmem>>, vector<16x128xf32>,
    %cst_9 = arith.constant 0.000000e+00 : f32
    %15 = vector.broadcast %cst_9 : f32 to vector<2x32xf32>
    %c0_10 = arith.constant 0 : index
    %c0_11 = arith.constant 0 : index
    %16 = vector.load %arg3[%c0_10, %c0_11] : memref<16x128xf32, #tpu.memory_space<vmem>>, vector<2x128xf32>
    %17 = math.tanh %16 : vector<2x128xf32>
    %cst_12 = arith.constant 5.000000e-01 : f32
    %18 = vector.broadcast %cst_12 : f32 to vector<2x128xf32>
    %19 = arith.mulf %17, %18 : vector<2x128xf32>
    %cst_13 = arith.constant 5.000000e-01 : f32
    %20 = vector.broadcast %cst_13 : f32 to vector<2x128xf32>
    %21 = arith.addf %19, %20 : vector<2x128xf32>
    %22 = vector.extract_strided_slice %21 {offsets = [0, 0], sizes = [2, 32], strides = [1, 1]} : vector<2x128xf32> to vector<2x32xf32>
    %23 = vector.extract_strided_slice %21 {offsets = [0, 32], sizes = [2, 32], strides = [1, 1]} : vector<2x128xf32> to vector<2x32xf32>
    %24 = vector.extract_strided_slice %17 {offsets = [0, 64], sizes = [2, 32], strides = [1, 1]} : vector<2x128xf32> to vector<2x32xf32>
    %25 = vector.extract_strided_slice %21 {offsets = [0, 96], sizes = [2, 32], strides = [1, 1]} : vector<2x128xf32> to vector<2x32xf32>
    %26 = arith.mulf %23, %15 : vector<2x32xf32>
    %27 = arith.mulf %22, %24 : vector<2x32xf32>
    %28 = arith.addf %26, %27 : vector<2x32xf32>
    %29 = math.tanh %28 : vector<2x32xf32>
    %30 = arith.mulf %25, %29 : vector<2x32xf32>
    %c2 = arith.constant 2 : index
    %c0_14 = arith.constant 0 : index
    %31 = vector.load %arg3[%c2, %c0_14] : memref<16x128xf32, #tpu.memory_space<vmem>>, vector<2x128xf32>
    %cst_15 = arith.constant dense<0.000000e+00> : vector<2x128xf32>
    %32 = tpu.matmul %30, %1, %cst_15 {dimension_numbers = #tpu.dot_dimension_numbers<[1], [0], [0], [1], [0, 0, 1, 1], [], []>} : vector<2x32xf32>, vector<32x128xf32>, vector<2x128xf32> -> vector<2x128xf32>
    %33 = arith.addf %31, %32 : vector<2x128xf32>
    %34 = math.tanh %33 : vector<2x128xf32>
    %cst_16 = arith.constant 5.000000e-01 : f32
    %35 = vector.broadcast %cst_16 : f32 to vector<2x128xf32>
    %36 = arith.mulf %34, %35 : vector<2x128xf32>
    %cst_17 = arith.constant 5.000000e-01 : f32
    %37 = vector.broadcast %cst_17 : f32 to vector<2x128xf32>
    %38 = arith.addf %36, %37 : vector<2x128xf32>
    %39 = vector.extract_strided_slice %38 {offsets = [0, 0], sizes = [2, 32], strides = [1, 1]} : vector<2x128xf32> to vector<2x32xf32>
    %40 = vector.extract_strided_slice %38 {offsets = [0, 32], sizes = [2, 32], strides = [1, 1]} : vector<2x128xf32> to vector<2x32xf32>
    %41 = vector.extract_strided_slice %34 {offsets = [0, 64], sizes = [2, 32], strides = [1, 1]} : vector<2x128xf32> to vector<2x32xf32>
    %42 = vector.extract_strided_slice %38 {offsets = [0, 96], sizes = [2, 32], strides = [1, 1]} : vector<2x128xf32> to vector<2x32xf32>
    %43 = arith.mulf %40, %28 : vector<2x32xf32>
    %44 = arith.mulf %39, %41 : vector<2x32xf32>
    %45 = arith.addf %43, %44 : vector<2x32xf32>
    %46 = math.tanh %45 : vector<2x32xf32>
    %47 = arith.mulf %42, %46 : vector<2x32xf32>
    %cst_18 = arith.constant dense<0.000000e+00> : vector<2x128xf32>
    %48 = tpu.matmul %30, %2, %cst_18 {dimension_numbers = #tpu.dot_dimension_numbers<[1], [0], [0], [1], [0, 0, 1, 1], [], []>} : vector<2x32xf32>, vector<32x128xf32>, vector<2x128xf32> -> vector<2x128xf32>
    %49 = arith.addf %48, %8 : vector<2x128xf32>
    %50 = math.tanh %49 : vector<2x128xf32>
    %cst_19 = arith.constant 5.000000e-01 : f32
    %51 = vector.broadcast %cst_19 : f32 to vector<2x128xf32>
    %52 = arith.mulf %50, %51 : vector<2x128xf32>
    %cst_20 = arith.constant 5.000000e-01 : f32
    %53 = vector.broadcast %cst_20 : f32 to vector<2x128xf32>
    %54 = arith.addf %52, %53 : vector<2x128xf32>
    %55 = vector.extract_strided_slice %54 {offsets = [0, 0], sizes = [2, 32], strides = [1, 1]} : vector<2x128xf32> to vector<2x32xf32>
    %56 = vector.extract_strided_slice %54 {offsets = [0, 32], sizes = [2, 32], strides = [1, 1]} : vector<2x128xf32> to vector<2x32xf32>
    %57 = vector.extract_strided_slice %50 {offsets = [0, 64], sizes = [2, 32], strides = [1, 1]} : vector<2x128xf32> to vector<2x32xf32>
    %58 = vector.extract_strided_slice %54 {offsets = [0, 96], sizes = [2, 32], strides = [1, 1]} : vector<2x128xf32> to vector<2x32xf32>
    %59 = arith.mulf %56, %15 : vector<2x32xf32>
    %60 = arith.mulf %55, %57 : vector<2x32xf32>
    %61 = arith.addf %59, %60 : vector<2x32xf32>
    %62 = math.tanh %61 : vector<2x32xf32>
    %63 = arith.mulf %58, %62 : vector<2x32xf32>
    %c4 = arith.constant 4 : index
    %c0_21 = arith.constant 0 : index
    %64 = vector.load %arg3[%c4, %c0_21] : memref<16x128xf32, #tpu.memory_space<vmem>>, vector<2x128xf32>
    %cst_22 = arith.constant dense<0.000000e+00> : vector<2x128xf32>
    %65 = tpu.matmul %47, %1, %cst_22 {dimension_numbers = #tpu.dot_dimension_numbers<[1], [0], [0], [1], [0, 0, 1, 1], [], []>} : vector<2x32xf32>, vector<32x128xf32>, vector<2x128xf32> -> vector<2x128xf32>
    %66 = arith.addf %64, %65 : vector<2x128xf32>
    %67 = math.tanh %66 : vector<2x128xf32>
    %cst_23 = arith.constant 5.000000e-01 : f32
    %68 = vector.broadcast %cst_23 : f32 to vector<2x128xf32>
    %69 = arith.mulf %67, %68 : vector<2x128xf32>
    %cst_24 = arith.constant 5.000000e-01 : f32
    %70 = vector.broadcast %cst_24 : f32 to vector<2x128xf32>
    %71 = arith.addf %69, %70 : vector<2x128xf32>
    %72 = vector.extract_strided_slice %71 {offsets = [0, 0], sizes = [2, 32], strides = [1, 1]} : vector<2x128xf32> to vector<2x32xf32>
    %73 = vector.extract_strided_slice %71 {offsets = [0, 32], sizes = [2, 32], strides = [1, 1]} : vector<2x128xf32> to vector<2x32xf32>
    %74 = vector.extract_strided_slice %67 {offsets = [0, 64], sizes = [2, 32], strides = [1, 1]} : vector<2x128xf32> to vector<2x32xf32>
    %75 = vector.extract_strided_slice %71 {offsets = [0, 96], sizes = [2, 32], strides = [1, 1]} : vector<2x128xf32> to vector<2x32xf32>
    %76 = arith.mulf %73, %45 : vector<2x32xf32>
    %77 = arith.mulf %72, %74 : vector<2x32xf32>
    %78 = arith.addf %76, %77 : vector<2x32xf32>
    %79 = math.tanh %78 : vector<2x32xf32>
    %80 = arith.mulf %75, %79 : vector<2x32xf32>
    %cst_25 = arith.constant dense<0.000000e+00> : vector<2x128xf32>
    %81 = tpu.matmul %47, %2, %cst_25 {dimension_numbers = #tpu.dot_dimension_numbers<[1], [0], [0], [1], [0, 0, 1, 1], [], []>} : vector<2x32xf32>, vector<32x128xf32>, vector<2x128xf32> -> vector<2x128xf32>
    %82 = arith.addf %81, %8 : vector<2x128xf32>
    %cst_26 = arith.constant dense<0.000000e+00> : vector<2x128xf32>
    %83 = tpu.matmul %63, %3, %cst_26 {dimension_numbers = #tpu.dot_dimension_numbers<[1], [0], [0], [1], [0, 0, 1, 1], [], []>} : vector<2x32xf32>, vector<32x128xf32>, vector<2x128xf32> -> vector<2x128xf32>
    %84 = arith.addf %82, %83 : vector<2x128xf32>
    %85 = math.tanh %84 : vector<2x128xf32>
    %cst_27 = arith.constant 5.000000e-01 : f32
    %86 = vector.broadcast %cst_27 : f32 to vector<2x128xf32>
    %87 = arith.mulf %85, %86 : vector<2x128xf32>
    %cst_28 = arith.constant 5.000000e-01 : f32
    %88 = vector.broadcast %cst_28 : f32 to vector<2x128xf32>
    %89 = arith.addf %87, %88 : vector<2x128xf32>
    %90 = vector.extract_strided_slice %89 {offsets = [0, 0], sizes = [2, 32], strides = [1, 1]} : vector<2x128xf32> to vector<2x32xf32>
    %91 = vector.extract_strided_slice %89 {offsets = [0, 32], sizes = [2, 32], strides = [1, 1]} : vector<2x128xf32> to vector<2x32xf32>
    %92 = vector.extract_strided_slice %85 {offsets = [0, 64], sizes = [2, 32], strides = [1, 1]} : vector<2x128xf32> to vector<2x32xf32>
    %93 = vector.extract_strided_slice %89 {offsets = [0, 96], sizes = [2, 32], strides = [1, 1]} : vector<2x128xf32> to vector<2x32xf32>
    %94 = arith.mulf %91, %61 : vector<2x32xf32>
    %95 = arith.mulf %90, %92 : vector<2x32xf32>
    %96 = arith.addf %94, %95 : vector<2x32xf32>
    %97 = math.tanh %96 : vector<2x32xf32>
    %98 = arith.mulf %93, %97 : vector<2x32xf32>
    %c6 = arith.constant 6 : index
    %c0_29 = arith.constant 0 : index
    %99 = vector.load %arg3[%c6, %c0_29] : memref<16x128xf32, #tpu.memory_space<vmem>>, vector<2x128xf32>
    %cst_30 = arith.constant dense<0.000000e+00> : vector<2x128xf32>
    %100 = tpu.matmul %80, %1, %cst_30 {dimension_numbers = #tpu.dot_dimension_numbers<[1], [0], [0], [1], [0, 0, 1, 1], [], []>} : vector<2x32xf32>, vector<32x128xf32>, vector<2x128xf32> -> vector<2x128xf32>
    %101 = arith.addf %99, %100 : vector<2x128xf32>
    %102 = math.tanh %101 : vector<2x128xf32>
    %cst_31 = arith.constant 5.000000e-01 : f32
    %103 = vector.broadcast %cst_31 : f32 to vector<2x128xf32>
    %104 = arith.mulf %102, %103 : vector<2x128xf32>
    %cst_32 = arith.constant 5.000000e-01 : f32
    %105 = vector.broadcast %cst_32 : f32 to vector<2x128xf32>
    %106 = arith.addf %104, %105 : vector<2x128xf32>
    %107 = vector.extract_strided_slice %106 {offsets = [0, 0], sizes = [2, 32], strides = [1, 1]} : vector<2x128xf32> to vector<2x32xf32>
    %108 = vector.extract_strided_slice %106 {offsets = [0, 32], sizes = [2, 32], strides = [1, 1]} : vector<2x128xf32> to vector<2x32xf32>
    %109 = vector.extract_strided_slice %102 {offsets = [0, 64], sizes = [2, 32], strides = [1, 1]} : vector<2x128xf32> to vector<2x32xf32>
    %110 = vector.extract_strided_slice %106 {offsets = [0, 96], sizes = [2, 32], strides = [1, 1]} : vector<2x128xf32> to vector<2x32xf32>
    %111 = arith.mulf %108, %78 : vector<2x32xf32>
    %112 = arith.mulf %107, %109 : vector<2x32xf32>
    %113 = arith.addf %111, %112 : vector<2x32xf32>
    %114 = math.tanh %113 : vector<2x32xf32>
    %115 = arith.mulf %110, %114 : vector<2x32xf32>
    %cst_33 = arith.constant dense<0.000000e+00> : vector<2x128xf32>
    %116 = tpu.matmul %80, %2, %cst_33 {dimension_numbers = #tpu.dot_dimension_numbers<[1], [0], [0], [1], [0, 0, 1, 1], [], []>} : vector<2x32xf32>, vector<32x128xf32>, vector<2x128xf32> -> vector<2x128xf32>
    %117 = arith.addf %116, %8 : vector<2x128xf32>
    %cst_34 = arith.constant dense<0.000000e+00> : vector<2x128xf32>
    %118 = tpu.matmul %98, %3, %cst_34 {dimension_numbers = #tpu.dot_dimension_numbers<[1], [0], [0], [1], [0, 0, 1, 1], [], []>} : vector<2x32xf32>, vector<32x128xf32>, vector<2x128xf32> -> vector<2x128xf32>
    %119 = arith.addf %117, %118 : vector<2x128xf32>
    %120 = math.tanh %119 : vector<2x128xf32>
    %cst_35 = arith.constant 5.000000e-01 : f32
    %121 = vector.broadcast %cst_35 : f32 to vector<2x128xf32>
    %122 = arith.mulf %120, %121 : vector<2x128xf32>
    %cst_36 = arith.constant 5.000000e-01 : f32
    %123 = vector.broadcast %cst_36 : f32 to vector<2x128xf32>
    %124 = arith.addf %122, %123 : vector<2x128xf32>
    %125 = vector.extract_strided_slice %124 {offsets = [0, 0], sizes = [2, 32], strides = [1, 1]} : vector<2x128xf32> to vector<2x32xf32>
    %126 = vector.extract_strided_slice %124 {offsets = [0, 32], sizes = [2, 32], strides = [1, 1]} : vector<2x128xf32> to vector<2x32xf32>
    %127 = vector.extract_strided_slice %120 {offsets = [0, 64], sizes = [2, 32], strides = [1, 1]} : vector<2x128xf32> to vector<2x32xf32>
    %128 = vector.extract_strided_slice %124 {offsets = [0, 96], sizes = [2, 32], strides = [1, 1]} : vector<2x128xf32> to vector<2x32xf32>
    %129 = arith.mulf %126, %96 : vector<2x32xf32>
    %130 = arith.mulf %125, %127 : vector<2x32xf32>
    %131 = arith.addf %129, %130 : vector<2x32xf32>
    %132 = math.tanh %131 : vector<2x32xf32>
    %133 = arith.mulf %128, %132 : vector<2x32xf32>
    %c8 = arith.constant 8 : index
    %c0_37 = arith.constant 0 : index
    %134 = vector.load %arg3[%c8, %c0_37] : memref<16x128xf32, #tpu.memory_space<vmem>>, vector<2x128xf32>
    %cst_38 = arith.constant dense<0.000000e+00> : vector<2x128xf32>
    %135 = tpu.matmul %115, %1, %cst_38 {dimension_numbers = #tpu.dot_dimension_numbers<[1], [0], [0], [1], [0, 0, 1, 1], [], []>} : vector<2x32xf32>, vector<32x128xf32>, vector<2x128xf32> -> vector<2x128xf32>
    %136 = arith.addf %134, %135 : vector<2x128xf32>
    %137 = math.tanh %136 : vector<2x128xf32>
    %cst_39 = arith.constant 5.000000e-01 : f32
    %138 = vector.broadcast %cst_39 : f32 to vector<2x128xf32>
    %139 = arith.mulf %137, %138 : vector<2x128xf32>
    %cst_40 = arith.constant 5.000000e-01 : f32
    %140 = vector.broadcast %cst_40 : f32 to vector<2x128xf32>
    %141 = arith.addf %139, %140 : vector<2x128xf32>
    %142 = vector.extract_strided_slice %141 {offsets = [0, 0], sizes = [2, 32], strides = [1, 1]} : vector<2x128xf32> to vector<2x32xf32>
    %143 = vector.extract_strided_slice %141 {offsets = [0, 32], sizes = [2, 32], strides = [1, 1]} : vector<2x128xf32> to vector<2x32xf32>
    %144 = vector.extract_strided_slice %137 {offsets = [0, 64], sizes = [2, 32], strides = [1, 1]} : vector<2x128xf32> to vector<2x32xf32>
    %145 = vector.extract_strided_slice %141 {offsets = [0, 96], sizes = [2, 32], strides = [1, 1]} : vector<2x128xf32> to vector<2x32xf32>
    %146 = arith.mulf %143, %113 : vector<2x32xf32>
    %147 = arith.mulf %142, %144 : vector<2x32xf32>
    %148 = arith.addf %146, %147 : vector<2x32xf32>
    %149 = math.tanh %148 : vector<2x32xf32>
    %150 = arith.mulf %145, %149 : vector<2x32xf32>
    %cst_41 = arith.constant dense<0.000000e+00> : vector<2x128xf32>
    %151 = tpu.matmul %115, %2, %cst_41 {dimension_numbers = #tpu.dot_dimension_numbers<[1], [0], [0], [1], [0, 0, 1, 1], [], []>} : vector<2x32xf32>, vector<32x128xf32>, vector<2x128xf32> -> vector<2x128xf32>
    %152 = arith.addf %151, %8 : vector<2x128xf32>
    %cst_42 = arith.constant dense<0.000000e+00> : vector<2x128xf32>
    %153 = tpu.matmul %133, %3, %cst_42 {dimension_numbers = #tpu.dot_dimension_numbers<[1], [0], [0], [1], [0, 0, 1, 1], [], []>} : vector<2x32xf32>, vector<32x128xf32>, vector<2x128xf32> -> vector<2x128xf32>
    %154 = arith.addf %152, %153 : vector<2x128xf32>
    %155 = math.tanh %154 : vector<2x128xf32>
    %cst_43 = arith.constant 5.000000e-01 : f32
    %156 = vector.broadcast %cst_43 : f32 to vector<2x128xf32>
    %157 = arith.mulf %155, %156 : vector<2x128xf32>
    %cst_44 = arith.constant 5.000000e-01 : f32
    %158 = vector.broadcast %cst_44 : f32 to vector<2x128xf32>
    %159 = arith.addf %157, %158 : vector<2x128xf32>
    %160 = vector.extract_strided_slice %159 {offsets = [0, 0], sizes = [2, 32], strides = [1, 1]} : vector<2x128xf32> to vector<2x32xf32>
    %161 = vector.extract_strided_slice %159 {offsets = [0, 32], sizes = [2, 32], strides = [1, 1]} : vector<2x128xf32> to vector<2x32xf32>
    %162 = vector.extract_strided_slice %155 {offsets = [0, 64], sizes = [2, 32], strides = [1, 1]} : vector<2x128xf32> to vector<2x32xf32>
    %163 = vector.extract_strided_slice %159 {offsets = [0, 96], sizes = [2, 32], strides = [1, 1]} : vector<2x128xf32> to vector<2x32xf32>
    %164 = arith.mulf %161, %131 : vector<2x32xf32>
    %165 = arith.mulf %160, %162 : vector<2x32xf32>
    %166 = arith.addf %164, %165 : vector<2x32xf32>
    %167 = math.tanh %166 : vector<2x32xf32>
    %168 = arith.mulf %163, %167 : vector<2x32xf32>
    %c10 = arith.constant 10 : index
    %c0_45 = arith.constant 0 : index
    %169 = vector.load %arg3[%c10, %c0_45] : memref<16x128xf32, #tpu.memory_space<vmem>>, vector<2x128xf32>
    %cst_46 = arith.constant dense<0.000000e+00> : vector<2x128xf32>
    %170 = tpu.matmul %150, %1, %cst_46 {dimension_numbers = #tpu.dot_dimension_numbers<[1], [0], [0], [1], [0, 0, 1, 1], [], []>} : vector<2x32xf32>, vector<32x128xf32>, vector<2x128xf32> -> vector<2x128xf32>
    %171 = arith.addf %169, %170 : vector<2x128xf32>
    %172 = math.tanh %171 : vector<2x128xf32>
    %cst_47 = arith.constant 5.000000e-01 : f32
    %173 = vector.broadcast %cst_47 : f32 to vector<2x128xf32>
    %174 = arith.mulf %172, %173 : vector<2x128xf32>
    %cst_48 = arith.constant 5.000000e-01 : f32
    %175 = vector.broadcast %cst_48 : f32 to vector<2x128xf32>
    %176 = arith.addf %174, %175 : vector<2x128xf32>
    %177 = vector.extract_strided_slice %176 {offsets = [0, 0], sizes = [2, 32], strides = [1, 1]} : vector<2x128xf32> to vector<2x32xf32>
    %178 = vector.extract_strided_slice %176 {offsets = [0, 32], sizes = [2, 32], strides = [1, 1]} : vector<2x128xf32> to vector<2x32xf32>
    %179 = vector.extract_strided_slice %172 {offsets = [0, 64], sizes = [2, 32], strides = [1, 1]} : vector<2x128xf32> to vector<2x32xf32>
    %180 = vector.extract_strided_slice %176 {offsets = [0, 96], sizes = [2, 32], strides = [1, 1]} : vector<2x128xf32> to vector<2x32xf32>
    %181 = arith.mulf %178, %148 : vector<2x32xf32>
    %182 = arith.mulf %177, %179 : vector<2x32xf32>
    %183 = arith.addf %181, %182 : vector<2x32xf32>
    %184 = math.tanh %183 : vector<2x32xf32>
    %185 = arith.mulf %180, %184 : vector<2x32xf32>
    %cst_49 = arith.constant dense<0.000000e+00> : vector<2x128xf32>
    %186 = tpu.matmul %150, %2, %cst_49 {dimension_numbers = #tpu.dot_dimension_numbers<[1], [0], [0], [1], [0, 0, 1, 1], [], []>} : vector<2x32xf32>, vector<32x128xf32>, vector<2x128xf32> -> vector<2x128xf32>
    %187 = arith.addf %186, %8 : vector<2x128xf32>
    %cst_50 = arith.constant dense<0.000000e+00> : vector<2x128xf32>
    %188 = tpu.matmul %168, %3, %cst_50 {dimension_numbers = #tpu.dot_dimension_numbers<[1], [0], [0], [1], [0, 0, 1, 1], [], []>} : vector<2x32xf32>, vector<32x128xf32>, vector<2x128xf32> -> vector<2x128xf32>
    %189 = arith.addf %187, %188 : vector<2x128xf32>
    %190 = math.tanh %189 : vector<2x128xf32>
    %cst_51 = arith.constant 5.000000e-01 : f32
    %191 = vector.broadcast %cst_51 : f32 to vector<2x128xf32>
    %192 = arith.mulf %190, %191 : vector<2x128xf32>
    %cst_52 = arith.constant 5.000000e-01 : f32
    %193 = vector.broadcast %cst_52 : f32 to vector<2x128xf32>
    %194 = arith.addf %192, %193 : vector<2x128xf32>
    %195 = vector.extract_strided_slice %194 {offsets = [0, 0], sizes = [2, 32], strides = [1, 1]} : vector<2x128xf32> to vector<2x32xf32>
    %196 = vector.extract_strided_slice %194 {offsets = [0, 32], sizes = [2, 32], strides = [1, 1]} : vector<2x128xf32> to vector<2x32xf32>
    %197 = vector.extract_strided_slice %190 {offsets = [0, 64], sizes = [2, 32], strides = [1, 1]} : vector<2x128xf32> to vector<2x32xf32>
    %198 = vector.extract_strided_slice %194 {offsets = [0, 96], sizes = [2, 32], strides = [1, 1]} : vector<2x128xf32> to vector<2x32xf32>
    %199 = arith.mulf %196, %166 : vector<2x32xf32>
    %200 = arith.mulf %195, %197 : vector<2x32xf32>
    %201 = arith.addf %199, %200 : vector<2x32xf32>
    %202 = math.tanh %201 : vector<2x32xf32>
    %203 = arith.mulf %198, %202 : vector<2x32xf32>
    %c12 = arith.constant 12 : index
    %c0_53 = arith.constant 0 : index
    %204 = vector.load %arg3[%c12, %c0_53] : memref<16x128xf32, #tpu.memory_space<vmem>>, vector<2x128xf32>
    %cst_54 = arith.constant dense<0.000000e+00> : vector<2x128xf32>
    %205 = tpu.matmul %185, %1, %cst_54 {dimension_numbers = #tpu.dot_dimension_numbers<[1], [0], [0], [1], [0, 0, 1, 1], [], []>} : vector<2x32xf32>, vector<32x128xf32>, vector<2x128xf32> -> vector<2x128xf32>
    %206 = arith.addf %204, %205 : vector<2x128xf32>
    %207 = math.tanh %206 : vector<2x128xf32>
    %cst_55 = arith.constant 5.000000e-01 : f32
    %208 = vector.broadcast %cst_55 : f32 to vector<2x128xf32>
    %209 = arith.mulf %207, %208 : vector<2x128xf32>
    %cst_56 = arith.constant 5.000000e-01 : f32
    %210 = vector.broadcast %cst_56 : f32 to vector<2x128xf32>
    %211 = arith.addf %209, %210 : vector<2x128xf32>
    %212 = vector.extract_strided_slice %211 {offsets = [0, 0], sizes = [2, 32], strides = [1, 1]} : vector<2x128xf32> to vector<2x32xf32>
    %213 = vector.extract_strided_slice %211 {offsets = [0, 32], sizes = [2, 32], strides = [1, 1]} : vector<2x128xf32> to vector<2x32xf32>
    %214 = vector.extract_strided_slice %207 {offsets = [0, 64], sizes = [2, 32], strides = [1, 1]} : vector<2x128xf32> to vector<2x32xf32>
    %215 = vector.extract_strided_slice %211 {offsets = [0, 96], sizes = [2, 32], strides = [1, 1]} : vector<2x128xf32> to vector<2x32xf32>
    %216 = arith.mulf %213, %183 : vector<2x32xf32>
    %217 = arith.mulf %212, %214 : vector<2x32xf32>
    %218 = arith.addf %216, %217 : vector<2x32xf32>
    %219 = math.tanh %218 : vector<2x32xf32>
    %220 = arith.mulf %215, %219 : vector<2x32xf32>
    %cst_57 = arith.constant dense<0.000000e+00> : vector<2x128xf32>
    %221 = tpu.matmul %185, %2, %cst_57 {dimension_numbers = #tpu.dot_dimension_numbers<[1], [0], [0], [1], [0, 0, 1, 1], [], []>} : vector<2x32xf32>, vector<32x128xf32>, vector<2x128xf32> -> vector<2x128xf32>
    %222 = arith.addf %221, %8 : vector<2x128xf32>
    %cst_58 = arith.constant dense<0.000000e+00> : vector<2x128xf32>
    %223 = tpu.matmul %203, %3, %cst_58 {dimension_numbers = #tpu.dot_dimension_numbers<[1], [0], [0], [1], [0, 0, 1, 1], [], []>} : vector<2x32xf32>, vector<32x128xf32>, vector<2x128xf32> -> vector<2x128xf32>
    %224 = arith.addf %222, %223 : vector<2x128xf32>
    %225 = math.tanh %224 : vector<2x128xf32>
    %cst_59 = arith.constant 5.000000e-01 : f32
    %226 = vector.broadcast %cst_59 : f32 to vector<2x128xf32>
    %227 = arith.mulf %225, %226 : vector<2x128xf32>
    %cst_60 = arith.constant 5.000000e-01 : f32
    %228 = vector.broadcast %cst_60 : f32 to vector<2x128xf32>
    %229 = arith.addf %227, %228 : vector<2x128xf32>
    %230 = vector.extract_strided_slice %229 {offsets = [0, 0], sizes = [2, 32], strides = [1, 1]} : vector<2x128xf32> to vector<2x32xf32>
    %231 = vector.extract_strided_slice %229 {offsets = [0, 32], sizes = [2, 32], strides = [1, 1]} : vector<2x128xf32> to vector<2x32xf32>
    %232 = vector.extract_strided_slice %225 {offsets = [0, 64], sizes = [2, 32], strides = [1, 1]} : vector<2x128xf32> to vector<2x32xf32>
    %233 = vector.extract_strided_slice %229 {offsets = [0, 96], sizes = [2, 32], strides = [1, 1]} : vector<2x128xf32> to vector<2x32xf32>
    %234 = arith.mulf %231, %201 : vector<2x32xf32>
    %235 = arith.mulf %230, %232 : vector<2x32xf32>
    %236 = arith.addf %234, %235 : vector<2x32xf32>
    %237 = math.tanh %236 : vector<2x32xf32>
    %238 = arith.mulf %233, %237 : vector<2x32xf32>
    %c14 = arith.constant 14 : index
    %c0_61 = arith.constant 0 : index
    %239 = vector.load %arg3[%c14, %c0_61] : memref<16x128xf32, #tpu.memory_space<vmem>>, vector<2x128xf32>
    %cst_62 = arith.constant dense<0.000000e+00> : vector<2x128xf32>
    %240 = tpu.matmul %220, %1, %cst_62 {dimension_numbers = #tpu.dot_dimension_numbers<[1], [0], [0], [1], [0, 0, 1, 1], [], []>} : vector<2x32xf32>, vector<32x128xf32>, vector<2x128xf32> -> vector<2x128xf32>
    %241 = arith.addf %239, %240 : vector<2x128xf32>
    %242 = math.tanh %241 : vector<2x128xf32>
    %cst_63 = arith.constant 5.000000e-01 : f32
    %243 = vector.broadcast %cst_63 : f32 to vector<2x128xf32>
    %244 = arith.mulf %242, %243 : vector<2x128xf32>
    %cst_64 = arith.constant 5.000000e-01 : f32
    %245 = vector.broadcast %cst_64 : f32 to vector<2x128xf32>
    %246 = arith.addf %244, %245 : vector<2x128xf32>
    %247 = vector.extract_strided_slice %246 {offsets = [0, 0], sizes = [2, 32], strides = [1, 1]} : vector<2x128xf32> to vector<2x32xf32>
    %248 = vector.extract_strided_slice %246 {offsets = [0, 32], sizes = [2, 32], strides = [1, 1]} : vector<2x128xf32> to vector<2x32xf32>
    %249 = vector.extract_strided_slice %242 {offsets = [0, 64], sizes = [2, 32], strides = [1, 1]} : vector<2x128xf32> to vector<2x32xf32>
    %250 = vector.extract_strided_slice %246 {offsets = [0, 96], sizes = [2, 32], strides = [1, 1]} : vector<2x128xf32> to vector<2x32xf32>
    %251 = arith.mulf %248, %218 : vector<2x32xf32>
    %252 = arith.mulf %247, %249 : vector<2x32xf32>
    %253 = arith.addf %251, %252 : vector<2x32xf32>
    %254 = math.tanh %253 : vector<2x32xf32>
    %255 = arith.mulf %250, %254 : vector<2x32xf32>
    %cst_65 = arith.constant dense<0.000000e+00> : vector<2x128xf32>
    %256 = tpu.matmul %220, %2, %cst_65 {dimension_numbers = #tpu.dot_dimension_numbers<[1], [0], [0], [1], [0, 0, 1, 1], [], []>} : vector<2x32xf32>, vector<32x128xf32>, vector<2x128xf32> -> vector<2x128xf32>
    %257 = arith.addf %256, %8 : vector<2x128xf32>
    %cst_66 = arith.constant dense<0.000000e+00> : vector<2x128xf32>
    %258 = tpu.matmul %238, %3, %cst_66 {dimension_numbers = #tpu.dot_dimension_numbers<[1], [0], [0], [1], [0, 0, 1, 1], [], []>} : vector<2x32xf32>, vector<32x128xf32>, vector<2x128xf32> -> vector<2x128xf32>
    %259 = arith.addf %257, %258 : vector<2x128xf32>
    %260 = math.tanh %259 : vector<2x128xf32>
    %cst_67 = arith.constant 5.000000e-01 : f32
    %261 = vector.broadcast %cst_67 : f32 to vector<2x128xf32>
    %262 = arith.mulf %260, %261 : vector<2x128xf32>
    %cst_68 = arith.constant 5.000000e-01 : f32
    %263 = vector.broadcast %cst_68 : f32 to vector<2x128xf32>
    %264 = arith.addf %262, %263 : vector<2x128xf32>
    %265 = vector.extract_strided_slice %264 {offsets = [0, 0], sizes = [2, 32], strides = [1, 1]} : vector<2x128xf32> to vector<2x32xf32>
    %266 = vector.extract_strided_slice %264 {offsets = [0, 32], sizes = [2, 32], strides = [1, 1]} : vector<2x128xf32> to vector<2x32xf32>
    %267 = vector.extract_strided_slice %260 {offsets = [0, 64], sizes = [2, 32], strides = [1, 1]} : vector<2x128xf32> to vector<2x32xf32>
    %268 = vector.extract_strided_slice %264 {offsets = [0, 96], sizes = [2, 32], strides = [1, 1]} : vector<2x128xf32> to vector<2x32xf32>
    %269 = arith.mulf %266, %236 : vector<2x32xf32>
    %270 = arith.mulf %265, %267 : vector<2x32xf32>
    %271 = arith.addf %269, %270 : vector<2x32xf32>
    %272 = math.tanh %271 : vector<2x32xf32>
    %273 = arith.mulf %268, %272 : vector<2x32xf32>
    %cst_69 = arith.constant dense<0.000000e+00> : vector<2x128xf32>
    %274 = tpu.matmul %255, %2, %cst_69 {dimension_numbers = #tpu.dot_dimension_numbers<[1], [0], [0], [1], [0, 0, 1, 1], [], []>} : vector<2x32xf32>, vector<32x128xf32>, vector<2x128xf32> -> vector<2x128xf32>
    %275 = arith.addf %274, %8 : vector<2x128xf32>
    %cst_70 = arith.constant dense<0.000000e+00> : vector<2x128xf32>
    %276 = tpu.matmul %273, %3, %cst_70 {dimension_numbers = #tpu.dot_dimension_numbers<[1], [0], [0], [1], [0, 0, 1, 1], [], []>} : vector<2x32xf32>, vector<32x128xf32>, vector<2x128xf32> -> vector<2x128xf32>
    %277 = arith.addf %275, %276 : vector<2x128xf32>
    %278 = math.tanh %277 : vector<2x128xf32>
    %cst_71 = arith.constant 5.000000e-01 : f32
    %279 = vector.broadcast %cst_71 : f32 to vector<2x128xf32>
    %280 = arith.mulf %278, %279 : vector<2x128xf32>
    %cst_72 = arith.constant 5.000000e-01 : f32
    %281 = vector.broadcast %cst_72 : f32 to vector<2x128xf32>
    %282 = arith.addf %280, %281 : vector<2x128xf32>
    %283 = vector.extract_strided_slice %282 {offsets = [0, 0], sizes = [2, 32], strides = [1, 1]} : vector<2x128xf32> to vector<2x32xf32>
    %284 = vector.extract_strided_slice %282 {offsets = [0, 32], sizes = [2, 32], strides = [1, 1]} : vector<2x128xf32> to vector<2x32xf32>
    %285 = vector.extract_strided_slice %278 {offsets = [0, 64], sizes = [2, 32], strides = [1, 1]} : vector<2x128xf32> to vector<2x32xf32>
    %286 = vector.extract_strided_slice %282 {offsets = [0, 96], sizes = [2, 32], strides = [1, 1]} : vector<2x128xf32> to vector<2x32xf32>
    %287 = arith.mulf %284, %271 : vector<2x32xf32>
    %288 = arith.mulf %283, %285 : vector<2x32xf32>
    %289 = arith.addf %287, %288 : vector<2x32xf32>
    %290 = math.tanh %289 : vector<2x32xf32>
    %291 = arith.mulf %286, %290 : vector<2x32xf32>
    %c224 = arith.constant 224 : index
    %c0_73 = arith.constant 0 : index
    %292 = vector.load %arg1[%c224, %c0_73] : memref<292x128xf32, #tpu.memory_space<vmem>>, vector<32x128xf32>
    %293 = vector.extract_strided_slice %292 {offsets = [0, 0], sizes = [32, 32], strides = [1, 1]} : vector<32x128xf32> to vector<32x32xf32>
    %294 = vector.extract_strided_slice %4 {offsets = [2, 0], sizes = [1, 32], strides = [1, 1]} : vector<4x128xf32> to vector<1x32xf32>
    %c256 = arith.constant 256 : index
    %c0_74 = arith.constant 0 : index
    %295 = vector.load %arg1[%c256, %c0_74] : memref<292x128xf32, #tpu.memory_space<vmem>>, vector<32x128xf32>
    %296 = vector.extract_strided_slice %4 {offsets = [3, 0], sizes = [1, 128], strides = [1, 1]} : vector<4x128xf32> to vector<1x128xf32>
    %cst_75 = arith.constant dense<0.000000e+00> : vector<2x32xf32>
    %297 = tpu.matmul %291, %293, %cst_75 {dimension_numbers = #tpu.dot_dimension_numbers<[1], [0], [0], [1], [0, 0, 1, 1], [], []>} : vector<2x32xf32>, vector<32x32xf32>, vector<2x32xf32> -> vector<2x32xf32>
    %298 = vector.broadcast %294 : vector<1x32xf32> to vector<2x32xf32>
    %299 = arith.addf %297, %298 : vector<2x32xf32>
    %cst_76 = arith.constant 0.000000e+00 : f32
    %300 = vector.broadcast %cst_76 : f32 to vector<2x32xf32>
    %301 = arith.maximumf %299, %300 : vector<2x32xf32>
    %cst_77 = arith.constant dense<0.000000e+00> : vector<2x128xf32>
    %302 = tpu.matmul %301, %295, %cst_77 {dimension_numbers = #tpu.dot_dimension_numbers<[1], [0], [0], [1], [0, 0, 1, 1], [], []>} : vector<2x32xf32>, vector<32x128xf32>, vector<2x128xf32> -> vector<2x128xf32>
    %303 = vector.broadcast %296 : vector<1x128xf32> to vector<2x128xf32>
    %304 = arith.addf %302, %303 : vector<2x128xf32>
    %c0_78 = arith.constant 0 : index
    %c0_79 = arith.constant 0 : index
    %305 = vector.load %arg2[%c0_78, %c0_79] : memref<2x128xf32, #tpu.memory_space<vmem>>, vector<2x128xf32>
    tpu.vector_store %arg2[%c0_78, %c0_79], %304 {strides = array<i32>} : memref<2x128xf32, #tpu.memory_space<vmem>>, vector<2x128xf32>,
    return
  }
}

</mosaic_0001>

<bundles_post_ra>
// kernel: ef_lstm_forward.1
= control target key start
LH: loop header
LB: loop body
LE: loop exit
PB: predicated region body
PF: predicated region fallthrough
CT: control target
= control target key end

     0   :  { %s1081_s17 = smov 64   ;;  %s1082_s18 = smov 32   ;;  %vm94_vm0 = vcmask 261120   ;;  %s1450_s1 = inlined_call_operand.vmem [shape: f32[292,128], index: 1, kind: input, shape index: {}]   ;;  %s1451_s0 = inlined_call_operand.vmem [shape: f32[16,128], index: 0, kind: input, shape index: {}]   ;;  %s1452_s2 = inlined_call_operand.vmem [shape: f32[2,128], index: 2, kind: output, shape index: {}]  }
   0x1   :  { %v26_v0 = vld [vmem:[%s1450_s1 + $0x78] sm:$0xff]  ;;  %v25_v1 = vld [vmem:[%s1450_s1 + $0x70] sm:$0xff]  ;;  %v24_v2 = vld [vmem:[%s1450_s1 + $0x68] sm:$0xff] }
   0x2   :  { %44 = vmatpush.msra.mxu0 %v26_v0  ;;  %v23_v3 = vld [vmem:[%s1450_s1 + $0x60] sm:$0xff]  ;;  %v22_v4 = vld [vmem:[%s1450_s1 + $0x58] sm:$0xff]  ;;  %v21_v5 = vld [vmem:[%s1450_s1 + $0x50] sm:$0xff] }
   0x3   :  { %v20_v6 = vld [vmem:[%s1450_s1 + $0x48] sm:$0xff]  ;;  %v19_v7 = vld [vmem:[%s1450_s1 + $0x40] sm:$0xff]  ;;  %v18_v8 = vld [vmem:[%s1450_s1 + $0x38] sm:$0xff] }
   0x4   :  { %45 = vmatpush.msra.mxu0 %v25_v1  ;;  %v17_v9 = vld [vmem:[%s1450_s1 + $0x30] sm:$0xff]  ;;  %v16_v10 = vld [vmem:[%s1450_s1 + $0x28] sm:$0xff]  ;;  %v15_v11 = vld [vmem:[%s1450_s1 + $0x20] sm:$0xff] }
   0x5   :  { %v14_v12 = vld [vmem:[%s1450_s1 + $0x18] sm:$0xff]  ;;  %v13_v13 = vld [vmem:[%s1450_s1 + $0x10] sm:$0xff]  ;;  %v12_v14 = vld [vmem:[%s1450_s1 + $0x8] sm:$0xff] }
   0x6   :  { %46 = vmatpush.msra.mxu0 %v24_v2  ;;  %v11_v15 = vld [vmem:[%s1450_s1] sm:$0xff]  ;;  %v1166_v31 = vld [vmem:[%s1450_s1 + $0x98] sm:$0xff]  ;;  %v1176_v33 = vld [vmem:[%s1450_s1 + $0x90] sm:$0xff] }
   0x7   :  { %v41_v16 = vld [vmem:[%s1451_s0] sm:$0xff]  ;;  %v1171_v32 = vld [vmem:[%s1450_s1 + $0xb8] sm:$0xff]  ;;  %109 = vmatpush.msra.mxu1 %v1166_v31  ;;  %v1183_v34 = vld [vmem:[%s1450_s1 + $0xb0] sm:$0xff]  ;;  %196 = vmatpush.msra.mxu3 %v1166_v31 }
   0x8   :  { %47 = vmatpush.msra.mxu0 %v23_v3  ;;  %v1152_v17 = vld [vmem:[%s1450_s1 + $0x120] sm:$0xf]  ;;  %150 = vmatpush.msra.mxu2 %v1171_v32  ;;  %v1188_v35 = vld [vmem:[%s1450_s1 + $0x88] sm:$0xff] }
   0x9   :  { %v43_v18 = vperm.slane %v1152_v17, 0  ;;  %v1193_v36 = vld [vmem:[%s1450_s1 + $0xa8] sm:$0xff]  ;;  %110 = vmatpush.msra.mxu1 %v1176_v33  ;;  %v1202_v37 = vld [vmem:[%s1450_s1 + $0x80] sm:$0xff]  ;;  %197 = vmatpush.msra.mxu3 %v1176_v33  ;;  %v1235_v45 = vperm.slane %v1152_v17, 1 }
   0xa   :  { %48 = vmatpush.msra.mxu0 %v22_v4  ;;  %151 = vmatpush.msra.mxu2 %v1183_v34  ;;  %v1207_v38 = vld [vmem:[%s1450_s1 + $0xa0] sm:$0xff] }
   0xb   :  { %111 = vmatpush.msra.mxu1 %v1188_v35  ;;  %198 = vmatpush.msra.mxu3 %v1188_v35 }
   0xc   :  { %49 = vmatpush.msra.mxu0 %v21_v5  ;;  %152 = vmatpush.msra.mxu2 %v1193_v36 }
   0xd   :  { %112 = vmatpush.msra.mxu1 %v1202_v37  ;;  %199 = vmatpush.msra.mxu3 %v1202_v37 }
   0xe   :  { %50 = vmatpush.msra.mxu0 %v20_v6  ;;  %153 = vmatpush.msra.mxu2 %v1207_v38  ;;  %v1256_v6 = vld [vmem:[%s1450_s1 + $0xd8] sm:$0xff] }
   0xf   :  { %237 = vmatpush.msrb.mxu1 %v1171_v32  ;;  %309 = vmatpush.msrb.mxu3 %v1166_v31 }
  0x10   :  { %51 = vmatpush.msra.mxu0 %v19_v7  ;;  %v1261_v7 = vld [vmem:[%s1450_s1 + $0xd0] sm:$0xff]  ;;  %262 = vmatpush.msrb.mxu2 %v1256_v6 }
  0x11   :  { %238 = vmatpush.msrb.mxu1 %v1183_v34  ;;  %310 = vmatpush.msrb.mxu3 %v1176_v33 }
  0x12   :  { %52 = vmatpush.msra.mxu0 %v18_v8  ;;  %v1268_v8 = vld [vmem:[%s1450_s1 + $0xc8] sm:$0xff]  ;;  %263 = vmatpush.msrb.mxu2 %v1261_v7 }
  0x13   :  { %239 = vmatpush.msrb.mxu1 %v1193_v36  ;;  %311 = vmatpush.msrb.mxu3 %v1188_v35 }
  0x14   :  { %53 = vmatpush.msra.mxu0 %v17_v9  ;;  %v1275_v9 = vld [vmem:[%s1450_s1 + $0xc0] sm:$0xff]  ;;  %264 = vmatpush.msrb.mxu2 %v1268_v8 }
  0x15   :  { %240 = vmatpush.msrb.mxu1 %v1207_v38  ;;  %312 = vmatpush.msrb.mxu3 %v1202_v37 }
  0x16   :  { %54 = vmatpush.msra.mxu0 %v16_v10  ;;  %265 = vmatpush.msrb.mxu2 %v1275_v9 }
  0x18   :  { %55 = vmatpush.msra.mxu0 %v15_v11 }
  0x1a   :  { %56 = vmatpush.msra.mxu0 %v14_v12 }
  0x1c   :  { %57 = vmatpush.msra.mxu0 %v13_v13 }
  0x1e   :  { %58 = vmatpush.msra.mxu0 %v12_v14 }
  0x20   :  { %59 = vmatpush.msra.mxu0 %v11_v15 }
  0x21   :  { %60 = vmatmul.f32.vlgmr.msra.gmra.mxu0 %v41_v16 }
  0x22   :  { %689 = vmatpush.msrb.mxu0 %v1171_v32 }
  0x24   :  { %690 = vmatpush.msrb.mxu0 %v1183_v34 }
  0x26   :  { %691 = vmatpush.msrb.mxu0 %v1193_v36 }
  0x28   :  { %692 = vmatpush.msrb.mxu0 %v1207_v38 }
  0x2a   :  { %827 = vmatpush.msra.mxu0 %v1256_v6 }
  0x2c   :  { %828 = vmatpush.msra.mxu0 %v1261_v7 }
  0x2e   :  { %829 = vmatpush.msra.mxu0 %v1268_v8 }
  0x30   :  { %830 = vmatpush.msra.mxu0 %v1275_v9 }
  0x9e   :  { %v61_v19 = vpop.f32.mrf.mxu0 }
  0x9f   :  { %v62_v20 = vadd.f32 %v61_v19, %v43_v18 }
  0xa1   :  { %67 = vst [vmem:[#allocation2] sm:$0xff] %v62_v20 }
  0xa8   :  { %v69_v21 = vld [vmem:[#allocation2] sm:$0x3]  ;;  %v90_v42 = vld [vmem:[#allocation2 + $0x2] sm:$0x3]  ;;  %v178_v12 = vld [vmem:[#allocation2 + $0x4] sm:$0x3] }
  0xa9   :  { %1017 = vtanh.f32 %v69_v21 }
  0xaf   :  { %v1018_v22 = vpop.eup %1017 }
  0xb0   :  { %75 = vrot.lane.b32.xlu0 %v1018_v22, %s1081_s17  ;;  %v71_v23 = vmul.f32 0.5, %v1018_v22 }
  0xb2   :  { %v72_v24 = vadd.f32 0.5, %v71_v23 }
  0xb4   :  { %v73_v27 = vmul.f32 0.0, %v72_v24 }
 0x122   :  { %v76_v25 = vpop.permute.xlu0 %75 }
 0x123   :  { %v78_v26 = vmul.f32 %v76_v25, %v72_v24 }
 0x125   :  { %80 = vrot.lane.b32.xlu0 %v78_v26, %s1082_s18 }
 0x197   :  { %v81_v28 = vpop.permute.xlu0 %80 }
 0x198   :  { %v1159_v29 = vadd.f32 %v81_v28, %v73_v27 }
 0x19a   :  { %1019 = vtanh.f32 %v1159_v29 }
 0x1a0   :  { %v1020_v30 = vpop.eup %1019 }
 0x1a1   :  { %86 = vrot.lane.b32.xlu1 %v1020_v30, %s1081_s17 }
 0x213   :  { %v87_v39 = vpop.permute.xlu1 %86 }
 0x214   :  { %v89_v40 = vmul.f32 %v87_v39, %v72_v24 }
 0x216   :  { %92 = vrot.lane.b32.xlu1 %v89_v40, %s1082_s18 }
 0x288   :  { %v93_v41 = vpop.permute.xlu1 %92 }
 0x289   :  { %991 = vmatmul.msk.f32.vlgmr.msra.gmra.mxu1 %vm94_vm0, %v93_v41  ;;  %992 = vmatmul.msk.f32.vlgmr.msra.gmra.mxu2 %vm94_vm0, %v93_v41 }
 0x28a   :  { %350 = vmatpush.msra.mxu1 %v1171_v32  ;;  %375 = vmatpush.msra.mxu2 %v1256_v6 }
 0x28c   :  { %351 = vmatpush.msra.mxu1 %v1183_v34  ;;  %376 = vmatpush.msra.mxu2 %v1261_v7 }
 0x28e   :  { %352 = vmatpush.msra.mxu1 %v1193_v36  ;;  %377 = vmatpush.msra.mxu2 %v1268_v8 }
 0x290   :  { %353 = vmatpush.msra.mxu1 %v1207_v38  ;;  %378 = vmatpush.msra.mxu2 %v1275_v9 }
 0x306   :  { %v114_v43 = vpop.f32.mrf.mxu1 }
 0x307   :  { %v117_v44 = vadd.f32 %v114_v43, %v90_v42 }
 0x309   :  { %1021 = vtanh.f32 %v117_v44 }
 0x30c   :  { %v155_v46 = vpop.f32.mrf.mxu2 }
 0x30d   :  { %v156_v47 = vadd.f32 %v155_v46, %v1235_v45 }
 0x30f   :  { %v1022_v48 = vpop.eup %1021  ;;  %1023 = vtanh.f32 %v156_v47 }
 0x310   :  { %123 = vrot.lane.b32.xlu2 %v1022_v48, %s1081_s17  ;;  %v119_v50 = vmul.f32 0.5, %v1022_v48 }
 0x312   :  { %v120_v51 = vadd.f32 0.5, %v119_v50 }
 0x314   :  { %v121_v58 = vmul.f32 %v120_v51, %v1159_v29 }
 0x315   :  { %v1024_v49 = vpop.eup %1023 }
 0x316   :  { %v159_v54 = vmul.f32 0.5, %v1024_v49 }
 0x318   :  { %163 = vrot.lane.b32.xlu2 %v1024_v49, %s1081_s17  ;;  %v160_v55 = vadd.f32 0.5, %v159_v54  ;;  %v291_v54 = vld [vmem:[#allocation2 + $0x6] sm:$0x3] }
 0x31a   :  { %v161_v61 = vmul.f32 0.0, %v160_v55 }
 0x36a   :  { %v124_v52 = vpop.permute.xlu2 %123 }
 0x36b   :  { %v126_v53 = vmul.f32 %v124_v52, %v120_v51 }
 0x36d   :  { %128 = vrot.lane.b32.xlu0 %v126_v53, %s1082_s18 }
 0x372   :  { %v164_v56 = vpop.permute.xlu2 %163 }
 0x373   :  { %v166_v57 = vmul.f32 %v164_v56, %v160_v55 }
 0x375   :  { %168 = vrot.lane.b32.xlu1 %v166_v57, %s1082_s18 }
 0x3df   :  { %v129_v59 = vpop.permute.xlu0 %128 }
 0x3e0   :  { %v1243_v60 = vadd.f32 %v129_v59, %v121_v58 }
 0x3e2   :  { %1025 = vtanh.f32 %v1243_v60 }
 0x3e7   :  { %v169_v62 = vpop.permute.xlu1 %168 }
 0x3e8   :  { %v1026_v63 = vpop.eup %1025  ;;  %v1246_v0 = vadd.f32 %v169_v62, %v161_v61 }
 0x3e9   :  { %134 = vrot.lane.b32.xlu2 %v1026_v63, %s1081_s17 }
 0x3ea   :  { %1027 = vtanh.f32 %v1246_v0 }
 0x3f0   :  { %v1028_v1 = vpop.eup %1027 }
 0x3f1   :  { %174 = vrot.lane.b32.xlu0 %v1028_v1, %s1081_s17 }
 0x443   :  { %v135_v2 = vpop.permute.xlu2 %134 }
 0x444   :  { %v137_v3 = vmul.f32 %v135_v2, %v120_v51 }
 0x446   :  { %180 = vrot.lane.b32.xlu1 %v137_v3, %s1082_s18 }
 0x463   :  { %v175_v4 = vpop.permute.xlu0 %174 }
 0x464   :  { %v177_v5 = vmul.f32 %v175_v4, %v160_v55 }
 0x466   :  { %246 = vrot.lane.b32.xlu2 %v177_v5, %s1082_s18 }
 0x4b8   :  { %v181_v10 = vpop.permute.xlu1 %180 }
 0x4b9   :  { %993 = vmatmul.msk.f32.vlgmr.msra.gmra.mxu3 %vm94_vm0, %v181_v10  ;;  %994 = vmatmul.msk.f32.vlgmr.msrb.gmra.mxu1 %vm94_vm0, %v181_v10 }
 0x4ba   :  { %422 = vmatpush.msra.mxu3 %v1166_v31  ;;  %463 = vmatpush.msrb.mxu1 %v1171_v32 }
 0x4bc   :  { %423 = vmatpush.msra.mxu3 %v1176_v33  ;;  %464 = vmatpush.msrb.mxu1 %v1183_v34 }
 0x4be   :  { %424 = vmatpush.msra.mxu3 %v1188_v35  ;;  %465 = vmatpush.msrb.mxu1 %v1193_v36 }
 0x4c0   :  { %v247_v11 = vpop.permute.xlu2 %246  ;;  %425 = vmatpush.msra.mxu3 %v1202_v37  ;;  %466 = vmatpush.msrb.mxu1 %v1207_v38 }
 0x4c1   :  { %995 = vmatmul.msk.f32.vlgmr.msrb.gmra.mxu2 %vm94_vm0, %v247_v11 }
 0x4c2   :  { %488 = vmatpush.msrb.mxu2 %v1256_v6 }
 0x4c4   :  { %489 = vmatpush.msrb.mxu2 %v1261_v7 }
 0x4c6   :  { %490 = vmatpush.msrb.mxu2 %v1268_v8 }
 0x4c8   :  { %491 = vmatpush.msrb.mxu2 %v1275_v9 }
 0x536   :  { %v242_v15 = vpop.f32.mrf.mxu1 }
 0x537   :  { %v243_v16 = vadd.f32 %v242_v15, %v1235_v45 }
 0x53c   :  { %v201_v13 = vpop.f32.mrf.mxu3 }
 0x53d   :  { %v204_v14 = vadd.f32 %v201_v13, %v178_v12 }
 0x53f   :  { %1029 = vtanh.f32 %v204_v14 }
 0x544   :  { %v267_v19 = vpop.f32.mrf.mxu2 }
 0x545   :  { %v1030_v20 = vpop.eup %1029  ;;  %v270_v21 = vadd.f32 %v267_v19, %v243_v16 }
 0x546   :  { %210 = vrot.lane.b32.xlu0 %v1030_v20, %s1081_s17  ;;  %v206_v23 = vmul.f32 0.5, %v1030_v20 }
 0x547   :  { %1031 = vtanh.f32 %v270_v21  ;;  %v42_v21 = vld [vmem:[%s1451_s0 + $0x8] sm:$0xff] }
 0x548   :  { %v207_v24 = vadd.f32 0.5, %v206_v23  ;;  %63 = vmatmul.f32.gmra.mxu0 %v42_v21 }
 0x54a   :  { %v208_v39 = vmul.f32 %v207_v24, %v1243_v60 }
 0x54d   :  { %v1032_v22 = vpop.eup %1031 }
 0x54e   :  { %276 = vrot.lane.b32.xlu1 %v1032_v22, %s1081_s17  ;;  %v272_v27 = vmul.f32 0.5, %v1032_v22 }
 0x550   :  { %v273_v28 = vadd.f32 0.5, %v272_v27 }
 0x552   :  { %v274_v43 = vmul.f32 %v273_v28, %v1246_v0 }
 0x5b8   :  { %v211_v25 = vpop.permute.xlu0 %210 }
 0x5b9   :  { %v213_v26 = vmul.f32 %v211_v25, %v207_v24 }
 0x5bb   :  { %215 = vrot.lane.b32.xlu2 %v213_v26, %s1082_s18 }
 0x5c0   :  { %v277_v29 = vpop.permute.xlu1 %276 }
 0x5c1   :  { %v279_v30 = vmul.f32 %v277_v29, %v273_v28 }
 0x5c3   :  { %281 = vrot.lane.b32.xlu0 %v279_v30, %s1082_s18 }
 0x5c5   :  { %v64_v27 = vpop.f32.mrf.mxu0 }
 0x615   :  { %v216_v40 = vpop.permute.xlu2 %215 }
 0x616   :  { %v218_v41 = vadd.f32 %v216_v40, %v208_v39 }
 0x618   :  { %1033 = vtanh.f32 %v218_v41 }
 0x61e   :  { %v1034_v42 = vpop.eup %1033 }
 0x61f   :  { %221 = vrot.lane.b32.xlu1 %v1034_v42, %s1081_s17 }
 0x635   :  { %v282_v44 = vpop.permute.xlu0 %281 }
 0x636   :  { %v284_v46 = vadd.f32 %v282_v44, %v274_v43 }
 0x638   :  { %1035 = vtanh.f32 %v284_v46 }
 0x63e   :  { %v1036_v47 = vpop.eup %1035 }
 0x63f   :  { %287 = vrot.lane.b32.xlu2 %v1036_v47, %s1081_s17 }
 0x691   :  { %v222_v48 = vpop.permute.xlu1 %221 }
 0x692   :  { %v224_v49 = vmul.f32 %v222_v48, %v207_v24 }
 0x694   :  { %293 = vrot.lane.b32.xlu0 %v224_v49, %s1082_s18 }
 0x699   :  { %v288_v50 = vpop.permute.xlu2 %287 }
 0x69a   :  { %v290_v51 = vmul.f32 %v288_v50, %v273_v28  ;;  %v65_v28 = vadd.f32 %v64_v27, %v43_v18 }
 0x69c   :  { %359 = vrot.lane.b32.xlu1 %v290_v51, %s1082_s18  ;;  %68 = vst [vmem:[#allocation2 + $0x8] sm:$0xff] %v65_v28 }
 0x6a3   :  { %v404_v30 = vld [vmem:[#allocation2 + $0x8] sm:$0x3] }
 0x706   :  { %v294_v52 = vpop.permute.xlu0 %293 }
 0x707   :  { %996 = vmatmul.msk.f32.vlgmr.msrb.gmra.mxu3 %vm94_vm0, %v294_v52  ;;  %997 = vmatmul.msk.f32.vlgmr.msra.gmra.mxu1 %vm94_vm0, %v294_v52 }
 0x708   :  { %535 = vmatpush.msrb.mxu3 %v1166_v31  ;;  %576 = vmatpush.msra.mxu1 %v1171_v32 }
 0x70a   :  { %536 = vmatpush.msrb.mxu3 %v1176_v33  ;;  %577 = vmatpush.msra.mxu1 %v1183_v34 }
 0x70c   :  { %537 = vmatpush.msrb.mxu3 %v1188_v35  ;;  %578 = vmatpush.msra.mxu1 %v1193_v36 }
 0x70e   :  { %v360_v53 = vpop.permute.xlu1 %359  ;;  %538 = vmatpush.msrb.mxu3 %v1202_v37  ;;  %579 = vmatpush.msra.mxu1 %v1207_v38 }
 0x70f   :  { %998 = vmatmul.msk.f32.vlgmr.msra.gmra.mxu2 %vm94_vm0, %v360_v53 }
 0x710   :  { %601 = vmatpush.msra.mxu2 %v1256_v6 }
 0x712   :  { %602 = vmatpush.msra.mxu2 %v1261_v7 }
 0x714   :  { %603 = vmatpush.msra.mxu2 %v1268_v8 }
 0x716   :  { %604 = vmatpush.msra.mxu2 %v1275_v9 }
 0x784   :  { %v355_v57 = vpop.f32.mrf.mxu1 }
 0x785   :  { %v356_v58 = vadd.f32 %v355_v57, %v1235_v45 }
 0x78a   :  { %v314_v55 = vpop.f32.mrf.mxu3 }
 0x78b   :  { %v317_v56 = vadd.f32 %v314_v55, %v291_v54 }
 0x78d   :  { %1037 = vtanh.f32 %v317_v56 }
 0x792   :  { %v380_v59 = vpop.f32.mrf.mxu2 }
 0x793   :  { %v1038_v60 = vpop.eup %1037  ;;  %v383_v61 = vadd.f32 %v380_v59, %v356_v58 }
 0x794   :  { %323 = vrot.lane.b32.xlu2 %v1038_v60, %s1081_s17  ;;  %v319_v63 = vmul.f32 0.5, %v1038_v60 }
 0x795   :  { %1039 = vtanh.f32 %v383_v61 }
 0x796   :  { %v320_v0 = vadd.f32 0.5, %v319_v63 }
 0x798   :  { %v321_v11 = vmul.f32 %v320_v0, %v218_v41 }
 0x79b   :  { %v1040_v62 = vpop.eup %1039 }
 0x79c   :  { %389 = vrot.lane.b32.xlu0 %v1040_v62, %s1081_s17  ;;  %v385_v3 = vmul.f32 0.5, %v1040_v62 }
 0x79e   :  { %v386_v4 = vadd.f32 0.5, %v385_v3 }
 0x7a0   :  { %v387_v14 = vmul.f32 %v386_v4, %v284_v46 }
 0x7ee   :  { %v324_v1 = vpop.permute.xlu2 %323 }
 0x7ef   :  { %v326_v2 = vmul.f32 %v324_v1, %v320_v0 }
 0x7f1   :  { %328 = vrot.lane.b32.xlu1 %v326_v2, %s1082_s18 }
 0x80e   :  { %v390_v5 = vpop.permute.xlu0 %389 }
 0x80f   :  { %v392_v10 = vmul.f32 %v390_v5, %v386_v4 }
 0x811   :  { %394 = vrot.lane.b32.xlu2 %v392_v10, %s1082_s18 }
 0x863   :  { %v329_v12 = vpop.permute.xlu1 %328 }
 0x864   :  { %v331_v13 = vadd.f32 %v329_v12, %v321_v11 }
 0x866   :  { %1041 = vtanh.f32 %v331_v13 }
 0x86b   :  { %v395_v15 = vpop.permute.xlu2 %394 }
 0x86c   :  { %v1042_v16 = vpop.eup %1041  ;;  %v397_v19 = vadd.f32 %v395_v15, %v387_v14 }
 0x86d   :  { %334 = vrot.lane.b32.xlu0 %v1042_v16, %s1081_s17 }
 0x86e   :  { %1043 = vtanh.f32 %v397_v19 }
 0x874   :  { %v1044_v20 = vpop.eup %1043 }
 0x875   :  { %400 = vrot.lane.b32.xlu1 %v1044_v20, %s1081_s17 }
 0x8df   :  { %v335_v22 = vpop.permute.xlu0 %334 }
 0x8e0   :  { %v337_v23 = vmul.f32 %v335_v22, %v320_v0 }
 0x8e2   :  { %406 = vrot.lane.b32.xlu2 %v337_v23, %s1082_s18 }
 0x8e7   :  { %v401_v24 = vpop.permute.xlu1 %400 }
 0x8e8   :  { %v403_v25 = vmul.f32 %v401_v24, %v386_v4 }
 0x8ea   :  { %472 = vrot.lane.b32.xlu0 %v403_v25, %s1082_s18 }
 0x93c   :  { %v407_v26 = vpop.permute.xlu2 %406 }
 0x93d   :  { %999 = vmatmul.msk.f32.vlgmr.msra.gmra.mxu3 %vm94_vm0, %v407_v26  ;;  %1000 = vmatmul.msk.f32.vlgmr.msrb.gmra.mxu1 %vm94_vm0, %v407_v26 }
 0x93e   :  { %648 = vmatpush.msra.mxu3 %v1166_v31  ;;  %714 = vmatpush.msrb.mxu1 %v1256_v6 }
 0x940   :  { %649 = vmatpush.msra.mxu3 %v1176_v33  ;;  %715 = vmatpush.msrb.mxu1 %v1261_v7 }
 0x942   :  { %650 = vmatpush.msra.mxu3 %v1188_v35  ;;  %716 = vmatpush.msrb.mxu1 %v1268_v8 }
 0x944   :  { %651 = vmatpush.msra.mxu3 %v1202_v37  ;;  %717 = vmatpush.msrb.mxu1 %v1275_v9 }
 0x95c   :  { %v473_v29 = vpop.permute.xlu0 %472 }
 0x95d   :  { %1001 = vmatmul.msk.f32.vlgmr.msrb.gmra.mxu2 %vm94_vm0, %v473_v29 }
 0x95e   :  { %761 = vmatpush.msrb.mxu2 %v1166_v31 }
 0x960   :  { %762 = vmatpush.msrb.mxu2 %v1176_v33 }
 0x962   :  { %763 = vmatpush.msrb.mxu2 %v1188_v35 }
 0x964   :  { %764 = vmatpush.msrb.mxu2 %v1202_v37 }
 0x9ba   :  { %v468_v18 = vpop.f32.mrf.mxu1 }
 0x9bb   :  { %v469_v42 = vadd.f32 %v468_v18, %v1235_v45 }
 0x9c0   :  { %v427_v39 = vpop.f32.mrf.mxu3 }
 0x9c1   :  { %v430_v40 = vadd.f32 %v427_v39, %v404_v30  ;;  %v630_v39 = vld [vmem:[#allocation2 + $0xc] sm:$0x3] }
 0x9c3   :  { %1045 = vtanh.f32 %v430_v40 }
 0x9c9   :  { %v1046_v41 = vpop.eup %1045 }
 0x9ca   :  { %436 = vrot.lane.b32.xlu1 %v1046_v41, %s1081_s17  ;;  %v432_v33 = vmul.f32 0.5, %v1046_v41 }
 0x9cc   :  { %v433_v35 = vadd.f32 0.5, %v432_v33 }
 0x9ce   :  { %v434_v51 = vmul.f32 %v433_v35, %v331_v13 }
 0x9e0   :  { %v493_v43 = vpop.f32.mrf.mxu2 }
 0x9e1   :  { %v496_v44 = vadd.f32 %v493_v43, %v469_v42 }
 0x9e3   :  { %1047 = vtanh.f32 %v496_v44 }
 0x9e9   :  { %v1048_v31 = vpop.eup %1047 }
 0x9ea   :  { %502 = vrot.lane.b32.xlu2 %v1048_v31, %s1081_s17  ;;  %v498_v47 = vmul.f32 0.5, %v1048_v31 }
 0x9ec   :  { %v499_v48 = vadd.f32 0.5, %v498_v47 }
 0x9ee   :  { %v500_v54 = vmul.f32 %v499_v48, %v397_v19 }
 0xa3c   :  { %v437_v46 = vpop.permute.xlu1 %436 }
 0xa3d   :  { %v439_v37 = vmul.f32 %v437_v46, %v433_v35 }
 0xa3f   :  { %441 = vrot.lane.b32.xlu0 %v439_v37, %s1082_s18 }
 0xa44   :  { %v503_v49 = vpop.permute.xlu2 %502 }
 0xa45   :  { %v505_v50 = vmul.f32 %v503_v49, %v499_v48 }
 0xa47   :  { %507 = vrot.lane.b32.xlu1 %v505_v50, %s1082_s18 }
 0xab1   :  { %v442_v52 = vpop.permute.xlu0 %441 }
 0xab2   :  { %v444_v53 = vadd.f32 %v442_v52, %v434_v51 }
 0xab4   :  { %1049 = vtanh.f32 %v444_v53 }
 0xab9   :  { %v508_v55 = vpop.permute.xlu1 %507 }
 0xaba   :  { %v1050_v56 = vpop.eup %1049  ;;  %v510_v57 = vadd.f32 %v508_v55, %v500_v54 }
 0xabb   :  { %447 = vrot.lane.b32.xlu2 %v1050_v56, %s1081_s17 }
 0xabc   :  { %1051 = vtanh.f32 %v510_v57 }
 0xac2   :  { %v1052_v58 = vpop.eup %1051 }
 0xac3   :  { %513 = vrot.lane.b32.xlu0 %v1052_v58, %s1081_s17 }
 0xb15   :  { %v448_v59 = vpop.permute.xlu2 %447 }
 0xb16   :  { %v450_v60 = vmul.f32 %v448_v59, %v433_v35 }
 0xb18   :  { %519 = vrot.lane.b32.xlu1 %v450_v60, %s1082_s18 }
 0xb35   :  { %v514_v61 = vpop.permute.xlu0 %513 }
 0xb36   :  { %v516_v62 = vmul.f32 %v514_v61, %v499_v48 }
 0xb38   :  { %585 = vrot.lane.b32.xlu2 %v516_v62, %s1082_s18 }
 0xb8a   :  { %v520_v63 = vpop.permute.xlu1 %519 }
 0xb8b   :  { %1002 = vmatmul.msk.f32.vlgmr.msrb.gmra.mxu3 %vm94_vm0, %v520_v63  ;;  %1003 = vmatmul.msk.f32.vlgmr.msra.gmra.mxu1 %vm94_vm0, %v520_v63 }
 0xb8c   :  { %802 = vmatpush.msrb.mxu3 %v1171_v32  ;;  %873 = vmatpush.msra.mxu1 %v1171_v32  ;;  %v517_v32 = vld [vmem:[#allocation2 + $0xa] sm:$0x3] }
 0xb8e   :  { %803 = vmatpush.msrb.mxu3 %v1183_v34  ;;  %874 = vmatpush.msra.mxu1 %v1183_v34 }
 0xb90   :  { %804 = vmatpush.msrb.mxu3 %v1193_v36  ;;  %875 = vmatpush.msra.mxu1 %v1193_v36 }
 0xb92   :  { %v586_v0 = vpop.permute.xlu2 %585  ;;  %805 = vmatpush.msrb.mxu3 %v1207_v38  ;;  %876 = vmatpush.msra.mxu1 %v1207_v38 }
 0xb93   :  { %1004 = vmatmul.msk.f32.vlgmr.msra.gmra.mxu2 %vm94_vm0, %v586_v0 }
 0xb94   :  { %898 = vmatpush.msra.mxu2 %v1256_v6 }
 0xb96   :  { %899 = vmatpush.msra.mxu2 %v1261_v7 }
 0xb98   :  { %900 = vmatpush.msra.mxu2 %v1268_v8 }
 0xb9a   :  { %901 = vmatpush.msra.mxu2 %v1275_v9 }
 0xc08   :  { %v581_v36 = vpop.f32.mrf.mxu1 }
 0xc09   :  { %v582_v2 = vadd.f32 %v581_v36, %v1235_v45 }
 0xc0e   :  { %v540_v34 = vpop.f32.mrf.mxu3 }
 0xc0f   :  { %v543_v1 = vadd.f32 %v540_v34, %v517_v32  ;;  %v743_v32 = vld [vmem:[#allocation2 + $0xe] sm:$0x3] }
 0xc11   :  { %1053 = vtanh.f32 %v543_v1 }
 0xc16   :  { %v606_v3 = vpop.f32.mrf.mxu2 }
 0xc17   :  { %v1054_v4 = vpop.eup %1053  ;;  %v609_v38 = vadd.f32 %v606_v3, %v582_v2 }
 0xc18   :  { %549 = vrot.lane.b32.xlu0 %v1054_v4, %s1081_s17  ;;  %v545_v7 = vmul.f32 0.5, %v1054_v4 }
 0xc19   :  { %1055 = vtanh.f32 %v609_v38 }
 0xc1a   :  { %v546_v8 = vadd.f32 0.5, %v545_v7 }
 0xc1c   :  { %v547_v14 = vmul.f32 %v546_v8, %v444_v53 }
 0xc1f   :  { %v1056_v6 = vpop.eup %1055 }
 0xc20   :  { %615 = vrot.lane.b32.xlu1 %v1056_v6, %s1081_s17  ;;  %v611_v10 = vmul.f32 0.5, %v1056_v6 }
 0xc22   :  { %v612_v11 = vadd.f32 0.5, %v611_v10 }
 0xc24   :  { %v613_v20 = vmul.f32 %v612_v11, %v510_v57 }
 0xc8a   :  { %v550_v5 = vpop.permute.xlu0 %549 }
 0xc8b   :  { %v552_v9 = vmul.f32 %v550_v5, %v546_v8 }
 0xc8d   :  { %554 = vrot.lane.b32.xlu2 %v552_v9, %s1082_s18 }
 0xc92   :  { %v616_v12 = vpop.permute.xlu1 %615 }
 0xc93   :  { %v618_v13 = vmul.f32 %v616_v12, %v612_v11 }
 0xc95   :  { %620 = vrot.lane.b32.xlu0 %v618_v13, %s1082_s18 }
 0xce7   :  { %v555_v15 = vpop.permute.xlu2 %554 }
 0xce8   :  { %v557_v16 = vadd.f32 %v555_v15, %v547_v14 }
 0xcea   :  { %1057 = vtanh.f32 %v557_v16 }
 0xcf0   :  { %v1058_v19 = vpop.eup %1057 }
 0xcf1   :  { %560 = vrot.lane.b32.xlu1 %v1058_v19, %s1081_s17 }
 0xd07   :  { %v621_v21 = vpop.permute.xlu0 %620 }
 0xd08   :  { %v623_v22 = vadd.f32 %v621_v21, %v613_v20 }
 0xd0a   :  { %1059 = vtanh.f32 %v623_v22 }
 0xd10   :  { %v1060_v23 = vpop.eup %1059 }
 0xd11   :  { %626 = vrot.lane.b32.xlu2 %v1060_v23, %s1081_s17 }
 0xd63   :  { %v561_v24 = vpop.permute.xlu1 %560 }
 0xd64   :  { %v563_v25 = vmul.f32 %v561_v24, %v546_v8 }
 0xd66   :  { %632 = vrot.lane.b32.xlu0 %v563_v25, %s1082_s18 }
 0xd6b   :  { %v627_v26 = vpop.permute.xlu2 %626 }
 0xd6c   :  { %v629_v27 = vmul.f32 %v627_v26, %v612_v11 }
 0xd6e   :  { %698 = vrot.lane.b32.xlu1 %v629_v27, %s1082_s18 }
 0xdd8   :  { %v633_v28 = vpop.permute.xlu0 %632 }
 0xdd9   :  { %1005 = vmatmul.msk.f32.vlgmr.msra.gmra.mxu3 %vm94_vm0, %v633_v28  ;;  %1006 = vmatmul.msk.f32.vlgmr.msrb.gmra.mxu0 %vm94_vm0, %v633_v28 }
 0xde0   :  { %v699_v29 = vpop.permute.xlu1 %698 }
 0xde1   :  { %1007 = vmatmul.msk.f32.vlgmr.msrb.gmra.mxu1 %vm94_vm0, %v699_v29 }
 0xe56   :  { %v694_v30 = vpop.f32.mrf.mxu0 }
 0xe57   :  { %v695_v41 = vadd.f32 %v694_v30, %v1235_v45 }
 0xe5c   :  { %v653_v40 = vpop.f32.mrf.mxu3 }
 0xe5d   :  { %v656_v18 = vadd.f32 %v653_v40, %v630_v39 }
 0xe5e   :  { %v719_v42 = vpop.f32.mrf.mxu1 }
 0xe5f   :  { %1061 = vtanh.f32 %v656_v18  ;;  %v722_v43 = vadd.f32 %v719_v42, %v695_v41 }
 0xe61   :  { %1063 = vtanh.f32 %v722_v43 }
 0xe65   :  { %v1062_v44 = vpop.eup %1061 }
 0xe66   :  { %662 = vrot.lane.b32.xlu2 %v1062_v44, %s1081_s17  ;;  %v658_v33 = vmul.f32 0.5, %v1062_v44 }
 0xe67   :  { %v1064_v31 = vpop.eup %1063 }
 0xe68   :  { %728 = vrot.lane.b32.xlu0 %v1064_v31, %s1081_s17  ;;  %v659_v35 = vadd.f32 0.5, %v658_v33  ;;  %v724_v47 = vmul.f32 0.5, %v1064_v31 }
 0xe6a   :  { %v725_v48 = vadd.f32 0.5, %v724_v47  ;;  %v660_v51 = vmul.f32 %v659_v35, %v557_v16  ;;  %v929_v47 = vld [vmem:[%s1450_s1 + $0xf0] sm:$0xff] }
 0xe6c   :  { %v726_v54 = vmul.f32 %v725_v48, %v623_v22 }
 0xec0   :  { %v663_v46 = vpop.permute.xlu2 %662 }
 0xec1   :  { %v665_v37 = vmul.f32 %v663_v46, %v659_v35 }
 0xec3   :  { %667 = vrot.lane.b32.xlu1 %v665_v37, %s1082_s18 }
 0xeda   :  { %v729_v49 = vpop.permute.xlu0 %728 }
 0xedb   :  { %v731_v50 = vmul.f32 %v729_v49, %v725_v48  ;;  %v927_v49 = vld [vmem:[%s1450_s1 + $0xe0] sm:$0xff] }
 0xedd   :  { %733 = vrot.lane.b32.xlu2 %v731_v50, %s1082_s18 }
 0xf35   :  { %v668_v52 = vpop.permute.xlu1 %667 }
 0xf36   :  { %v670_v53 = vadd.f32 %v668_v52, %v660_v51  ;;  %v934_v52 = vld [vmem:[%s1450_s1 + $0x118] sm:$0xff] }
 0xf37   :  { %v734_v55 = vpop.permute.xlu2 %733  ;;  %978 = vmatpush.msrb.mxu0 %v934_v52 }
 0xf38   :  { %1065 = vtanh.f32 %v670_v53  ;;  %v736_v56 = vadd.f32 %v734_v55, %v726_v54  ;;  %v932_v55 = vld [vmem:[%s1450_s1 + $0x108] sm:$0xff] }
 0xf3a   :  { %1067 = vtanh.f32 %v736_v56 }
 0xf3e   :  { %v1066_v57 = vpop.eup %1065 }
 0xf3f   :  { %673 = vrot.lane.b32.xlu0 %v1066_v57, %s1081_s17  ;;  %v935_v57 = vperm.slane %v1152_v17, 2 }
 0xf40   :  { %v1068_v58 = vpop.eup %1067 }
 0xf41   :  { %739 = vrot.lane.b32.xlu1 %v1068_v58, %s1081_s17 }
 0xfb1   :  { %v674_v59 = vpop.permute.xlu0 %673 }
 0xfb2   :  { %v676_v60 = vmul.f32 %v674_v59, %v659_v35 }
 0xfb3   :  { %v740_v61 = vpop.permute.xlu1 %739 }
 0xfb4   :  { %v742_v62 = vmul.f32 %v740_v61, %v725_v48  ;;  %745 = vrot.lane.b32.xlu2 %v676_v60, %s1082_s18  ;;  %v928_v48 = vld [vmem:[%s1450_s1 + $0xe8] sm:$0xff]  ;;  %v962_v61 = vperm.slane %v1152_v17, 3 }
 0xfb6   :  { %811 = vrot.lane.b32.xlu0 %v742_v62, %s1082_s18 }
0x100e   :  { %v746_v63 = vpop.permute.xlu2 %745 }
0x100f   :  { %1008 = vmatmul.msk.f32.vlgmr.msrb.gmra.mxu2 %vm94_vm0, %v746_v63  ;;  %1009 = vmatmul.msk.f32.vlgmr.msrb.gmra.mxu3 %vm94_vm0, %v746_v63 }
0x1028   :  { %v812_v0 = vpop.permute.xlu0 %811 }
0x1029   :  { %1010 = vmatmul.msk.f32.vlgmr.msra.gmra.mxu0 %vm94_vm0, %v812_v0 }
0x1092   :  { %v766_v34 = vpop.f32.mrf.mxu2  ;;  %v807_v2 = vpop.f32.mrf.mxu3 }
0x1093   :  { %v769_v1 = vadd.f32 %v766_v34, %v743_v32  ;;  %v808_v3 = vadd.f32 %v807_v2, %v1235_v45 }
0x1095   :  { %1069 = vtanh.f32 %v769_v1 }
0x109b   :  { %v1070_v36 = vpop.eup %1069 }
0x109c   :  { %775 = vrot.lane.b32.xlu2 %v1070_v36, %s1081_s17  ;;  %v771_v7 = vmul.f32 0.5, %v1070_v36 }
0x109e   :  { %v772_v8 = vadd.f32 0.5, %v771_v7 }
0x10a0   :  { %v773_v14 = vmul.f32 %v772_v8, %v670_v53  ;;  %v933_v53 = vld [vmem:[%s1450_s1 + $0x110] sm:$0xff] }
0x10a1   :  { %979 = vmatpush.msrb.mxu0 %v933_v53 }
0x10a3   :  { %980 = vmatpush.msrb.mxu0 %v932_v55 }
0x10a6   :  { %v832_v4 = vpop.f32.mrf.mxu0 }
0x10a7   :  { %v835_v38 = vadd.f32 %v832_v4, %v808_v3 }
0x10a9   :  { %1071 = vtanh.f32 %v835_v38 }
0x10af   :  { %v1072_v6 = vpop.eup %1071 }
0x10b0   :  { %841 = vrot.lane.b32.xlu1 %v1072_v6, %s1081_s17  ;;  %v837_v10 = vmul.f32 0.5, %v1072_v6 }
0x10b2   :  { %v838_v11 = vadd.f32 0.5, %v837_v10 }
0x10b4   :  { %v839_v20 = vmul.f32 %v838_v11, %v736_v56  ;;  %v931_v56 = vld [vmem:[%s1450_s1 + $0x100] sm:$0xff] }
0x10b5   :  { %981 = vmatpush.msrb.mxu0 %v931_v56 }
0x10f6   :  { %v776_v5 = vpop.permute.xlu2 %775 }
0x10f7   :  { %v778_v9 = vmul.f32 %v776_v5, %v772_v8 }
0x10f9   :  { %780 = vrot.lane.b32.xlu1 %v778_v9, %s1082_s18 }
0x1122   :  { %v842_v12 = vpop.permute.xlu1 %841 }
0x1123   :  { %v844_v13 = vmul.f32 %v842_v12, %v838_v11 }
0x1125   :  { %846 = vrot.lane.b32.xlu0 %v844_v13, %s1082_s18 }
0x116b   :  { %v781_v15 = vpop.permute.xlu1 %780 }
0x116c   :  { %v783_v16 = vadd.f32 %v781_v15, %v773_v14 }
0x116e   :  { %1073 = vtanh.f32 %v783_v16 }
0x1174   :  { %v1074_v19 = vpop.eup %1073 }
0x1175   :  { %786 = vrot.lane.b32.xlu0 %v1074_v19, %s1081_s17 }
0x1197   :  { %v847_v21 = vpop.permute.xlu0 %846 }
0x1198   :  { %v849_v22 = vadd.f32 %v847_v21, %v839_v20 }
0x119a   :  { %1075 = vtanh.f32 %v849_v22 }
0x11a0   :  { %v1076_v23 = vpop.eup %1075 }
0x11a1   :  { %852 = vrot.lane.b32.xlu2 %v1076_v23, %s1081_s17 }
0x11e7   :  { %v787_v24 = vpop.permute.xlu0 %786 }
0x11e8   :  { %v789_v25 = vmul.f32 %v787_v24, %v772_v8 }
0x11ea   :  { %857 = vrot.lane.b32.xlu2 %v789_v25, %s1082_s18 }
0x11fb   :  { %v853_v26 = vpop.permute.xlu2 %852 }
0x11fc   :  { %v855_v27 = vmul.f32 %v853_v26, %v838_v11 }
0x11fe   :  { %882 = vrot.lane.b32.xlu1 %v855_v27, %s1082_s18 }
0x1244   :  { %v858_v28 = vpop.permute.xlu2 %857 }
0x1245   :  { %1011 = vmatmul.msk.f32.vlgmr.msra.gmra.mxu1 %vm94_vm0, %v858_v28 }
0x1270   :  { %v883_v29 = vpop.permute.xlu1 %882 }
0x1271   :  { %1012 = vmatmul.msk.f32.vlgmr.msra.gmra.mxu2 %vm94_vm0, %v883_v29 }
0x12c2   :  { %v878_v30 = vpop.f32.mrf.mxu1 }
0x12c3   :  { %v879_v39 = vadd.f32 %v878_v30, %v1235_v45  ;;  %v930_v45 = vld [vmem:[%s1450_s1 + $0xf8] sm:$0xff] }
0x12c4   :  { %953 = vmatpush.msra.mxu3 %v930_v45 }
0x12c6   :  { %954 = vmatpush.msra.mxu3 %v929_v47 }
0x12c8   :  { %955 = vmatpush.msra.mxu3 %v928_v48 }
0x12ca   :  { %956 = vmatpush.msra.mxu3 %v927_v49 }
0x12f4   :  { %v903_v40 = vpop.f32.mrf.mxu2 }
0x12f5   :  { %v906_v41 = vadd.f32 %v903_v40, %v879_v39 }
0x12f7   :  { %1077 = vtanh.f32 %v906_v41 }
0x12fd   :  { %v1078_v18 = vpop.eup %1077 }
0x12fe   :  { %912 = vrot.lane.b32.xlu0 %v1078_v18, %s1081_s17  ;;  %v908_v42 = vmul.f32 0.5, %v1078_v18 }
0x1300   :  { %v909_v43 = vadd.f32 0.5, %v908_v42 }
0x1302   :  { %v910_v33 = vmul.f32 %v909_v43, %v849_v22 }
0x1370   :  { %v913_v44 = vpop.permute.xlu0 %912 }
0x1371   :  { %v915_v31 = vmul.f32 %v913_v44, %v909_v43 }
0x1373   :  { %917 = vrot.lane.b32.xlu1 %v915_v31, %s1082_s18 }
0x13e5   :  { %v918_v35 = vpop.permute.xlu1 %917 }
0x13e6   :  { %v920_v46 = vadd.f32 %v918_v35, %v910_v33 }
0x13e8   :  { %1079 = vtanh.f32 %v920_v46 }
0x13ee   :  { %v1080_v37 = vpop.eup %1079 }
0x13ef   :  { %923 = vrot.lane.b32.xlu2 %v1080_v37, %s1081_s17 }
0x1449   :  { %v924_v50 = vpop.permute.xlu2 %923 }
0x144a   :  { %v926_v51 = vmul.f32 %v924_v50, %v909_v43 }
0x144c   :  { %937 = vrot.lane.b32.xlu0 %v926_v51, %s1082_s18 }
0x14be   :  { %v938_v54 = vpop.permute.xlu0 %937 }
0x14bf   :  { %1013 = vmatmul.msk.f32.vlgmr.msra.gmra.mxu3 %vm94_vm0, %v938_v54 }
0x1542   :  { %v958_v58 = vpop.f32.mrf.mxu3 }
0x1543   :  { %v959_v59 = vadd.f32 %v958_v58, %v935_v57 }
0x1545   :  { %v961_v60 = vmax.f32 %v959_v59, 0.0 }
0x1547   :  { %1014 = vmatmul.msk.f32.vlgmr.msrb.gmra.mxu0 %vm94_vm0, %v961_v60 }
0x15c4   :  { %v983_v62 = vpop.f32.mrf.mxu0 }
0x15c5   :  { %v984_v63 = vadd.f32 %v983_v62, %v962_v61 }
0x15c7   :  { %986 = vst [vmem:[%s1452_s2] sm:$0x3] %v984_v63 }

</bundles_post_ra>
